<compile_context>
chip_gen: v6e
topology: v6e:2x2x1
jax: 0.10.0
libtpu: 0.0.40
codegen_flags: <defaults>
</compile_context>

<pallas_src>
import functools

import jax
import jax.numpy as jnp
from jax import lax
from jax.experimental import pallas as pl
from jax.experimental.pallas import tpu as pltpu

L2_REG = 0.02
_NEG_BIG = -1e30


def _round_up(x, m):
    return (x + m - 1) // m * m


def _npair_loss_kernel(anchor_ref, positive_ref, tcol_ref, trow_ref, out_ref,
                       m_sc, s_sc, w_sc, r_sc, l2_sc,
                       *, n_valid, block_rows, block_cols, need_mask):
    i = pl.program_id(0)          # anchor-row block
    j = pl.program_id(1)          # positive-row (= logit column) block
    n_col = pl.num_programs(1)

    # ------------------------------------------------------------------ init
    @pl.when(j == 0)
    def _():
        m_sc[...] = jnp.full(m_sc.shape, _NEG_BIG, jnp.float32)
        s_sc[...] = jnp.zeros(s_sc.shape, jnp.float32)
        w_sc[...] = jnp.zeros(w_sc.shape, jnp.float32)
        r_sc[...] = jnp.zeros(r_sc.shape, jnp.float32)
        a32 = anchor_ref[...].astype(jnp.float32)
        l2_sc[...] = jnp.sum(a32 * a32, keepdims=True)        # this block's anchor l2

    # Positive rows are counted exactly once (only by the i == 0 row block).
    @pl.when(i == 0)
    def _():
        p32 = positive_ref[...].astype(jnp.float32)
        l2_sc[...] = l2_sc[...] + jnp.sum(p32 * p32, keepdims=True)

    # --------------------------------------------------------------- logits
    # Contract the feature axis of BOTH operands: the MXU consumes positive
    # "transposed" natively (no XLU transpose, native dtype, f32 accumulation).
    a = anchor_ref[...]                       # (tq, Dp) native dtype
    p = positive_ref[...]                     # (tk, Dp) native dtype
    logit = lax.dot_general(
        a, p, dimension_numbers=(((1,), (1,)), ((), ())),
        preferred_element_type=jnp.float32)   # (tq, tk) f32

    t_col = tcol_ref[...]                     # (tq, 1) int32
    t_row = trow_ref[...]                     # (1, tk) int32
    match = t_col == t_row                    # (tq, tk) bool

    if need_mask:
        col_ids = lax.broadcasted_iota(jnp.int32, (1, block_cols), 1) + j * block_cols
        col_valid = col_ids < n_valid
        match = match & col_valid
        logit_lse = jnp.where(col_valid, logit, _NEG_BIG)
    else:
        logit_lse = logit

    # ------------------------------- online log-sum-exp over column blocks --
    m_prev = m_sc[...]
    m_new = jnp.maximum(m_prev, jnp.max(logit_lse, axis=-1, keepdims=True))
    alpha = jnp.exp(m_prev - m_new)
    s_sc[...] = alpha * s_sc[...] + jnp.sum(jnp.exp(logit_lse - m_new),
                                            axis=-1, keepdims=True)
    m_sc[...] = m_new

    # mask-weighted raw-logit sum and match counts (no rescaling needed).
    w_sc[...] = w_sc[...] + jnp.sum(jnp.where(match, logit, 0.0),
                                    axis=-1, keepdims=True)
    r_sc[...] = r_sc[...] + jnp.sum(jnp.where(match, 1.0, 0.0),
                                    axis=-1, keepdims=True)

    # -------------------------------------------------------------- finalize
    @pl.when(j == n_col - 1)
    def _():
        lse = m_sc[...] + jnp.log(s_sc[...])                  # (tq, 1)
        rowsum = jnp.maximum(r_sc[...], 1.0)                   # guard padded rows
        row_loss = lse - w_sc[...] / rowsum                    # exact divide
        if need_mask:
            row_ids = (lax.broadcasted_iota(jnp.int32, (block_rows, 1), 0)
                       + i * block_rows)
            row_loss = jnp.where(row_ids < n_valid, row_loss, 0.0)
        ce_part = jnp.sum(row_loss, axis=0, keepdims=True)     # (1, 1)

        # One lane-dense (8,128) tile per row block: [0,0]=ce, [0,1]=l2.
        lane = lax.broadcasted_iota(jnp.int32, out_ref.shape, 2)
        sub = lax.broadcasted_iota(jnp.int32, out_ref.shape, 1)
        out_ref[...] = (jnp.where((sub == 0) & (lane == 0), ce_part, 0.0)
                        + jnp.where((sub == 0) & (lane == 1), l2_sc[...], 0.0))


def npair_loss(anchor, positive, target, *, l2_reg=L2_REG,
               block_rows=None, block_cols=None):
    """anchor, positive: (B, D) float; target: (B,) integer class labels."""
    B, D = anchor.shape
    assert positive.shape == (B, D)

    itemsize = jnp.dtype(anchor.dtype).itemsize
    gran = {4: 8, 2: 16, 1: 32}.get(itemsize, 8)   # sublane packing granularity

    # Lane-dense padded sizes.
    Dp = _round_up(D, 128)
    Bp = _round_up(B, 128)

    # Column tile: largest divisor of Bp that is a multiple of 128 and <= target.
    tk_target = _round_up(block_cols, 128) if block_cols else 512
    m128 = Bp // 128
    g = 1
    for cand in range(min(m128, tk_target // 128), 0, -1):
        if m128 % cand == 0:
            g = cand
            break
    tk = 128 * g

    # Row tile: largest divisor of Bp that is a multiple of `gran` and <= target.
    tq_target = _round_up(block_rows, gran) if block_rows else 256
    tq_target = max(gran, min(tq_target, Bp))
    tq = gran
    for cand in range(tq_target, gran - 1, -gran):
        if Bp % cand == 0:
            tq = cand
            break

    n_row = Bp // tq
    n_col = Bp // tk

    # Zero-pad (padded rows MUST be exact zeros for the l2 term; labels -> -1).
    target = target.reshape(B).astype(jnp.int32)
    pad_b, pad_d = Bp - B, Dp - D
    if pad_b or pad_d:
        anchor_p = jnp.pad(anchor, ((0, pad_b), (0, pad_d)))
        positive_p = jnp.pad(positive, ((0, pad_b), (0, pad_d)))
    else:
        anchor_p, positive_p = anchor, positive
    target_p = jnp.pad(target, (0, pad_b), constant_values=-1) if pad_b else target
    t_col = target_p.reshape(Bp, 1)
    t_row = target_p.reshape(1, Bp)

    # Generation-aware VMEM limit (v5e/v6e 128 MiB, v7x 64 MiB).
    vmem_est = (2 * tq * Dp * itemsize          # anchor block, double-buffered
                + 2 * tk * Dp * itemsize        # positive block, double-buffered
                + 8 * tq * tk * 4               # logit + elementwise intermediates
                + 2 * (tq + tk) * 4             # label blocks
                + 2 * 8 * 128 * 4               # output tile
                + (4 * tq + 8) * 4              # scratch
                + (1 << 20))                    # slack
    try:
        cap = pltpu.get_tpu_info().vmem_capacity_bytes
    except Exception:
        cap = 64 * 1024 * 1024
    vmem_limit = int(min(max(int(1.3 * vmem_est), 32 * 1024 * 1024),
                         int(0.75 * cap)))

    cost = pl.CostEstimate(
        flops=2 * Bp * Bp * Dp + 10 * Bp * Bp + 4 * Bp * Dp,
        transcendentals=Bp * Bp + 2 * Bp,
        bytes_accessed=(n_col + n_row) * Bp * Dp * itemsize
                       + 8 * Bp + n_row * 8 * 128 * 4,
    )

    kernel = functools.partial(_npair_loss_kernel, n_valid=B,
                               block_rows=tq, block_cols=tk,
                               need_mask=(B != Bp))

    out = pl.pallas_call(
        kernel,
        out_shape=jax.ShapeDtypeStruct((n_row, 8, 128), jnp.float32),
        grid_spec=pltpu.PrefetchScalarGridSpec(
            num_scalar_prefetch=0,
            grid=(n_row, n_col),
            in_specs=[
                pl.BlockSpec((tq, Dp), lambda i, j: (i, 0)),   # anchor row block
                pl.BlockSpec((tk, Dp), lambda i, j: (j, 0)),   # positive col block
                pl.BlockSpec((tq, 1), lambda i, j: (i, 0)),    # labels (rows)
                pl.BlockSpec((1, tk), lambda i, j: (0, j)),    # labels (cols)
            ],
            out_specs=pl.BlockSpec((1, 8, 128), lambda i, j: (i, 0, 0)),
            scratch_shapes=[
                pltpu.VMEM((tq, 1), jnp.float32),   # running max
                pltpu.VMEM((tq, 1), jnp.float32),   # running exp-sum
                pltpu.VMEM((tq, 1), jnp.float32),   # running mask*logit sum
                pltpu.VMEM((tq, 1), jnp.float32),   # running match count
                pltpu.VMEM((1, 1), jnp.float32),    # l2 partial
            ],
        ),
        compiler_params=pltpu.CompilerParams(
            dimension_semantics=("parallel", "arbitrary"),
            vmem_limit_bytes=vmem_limit,
        ),
        cost_estimate=cost,
    )(anchor_p, positive_p, t_col, t_row)

    ce_sum = jnp.sum(out[:, 0, 0])
    l2_sum = jnp.sum(out[:, 0, 1])
    return ce_sum / B + l2_reg * (l2_sum / B) * 0.25


def npair_loss_ref(anchor, positive, target, l2_reg=L2_REG):
    """Pure-JAX reference mirroring the PyTorch forward."""
    B = anchor.shape[0]
    t = target.reshape(B, 1)
    tmat = (t == t.T).astype(jnp.float32)
    tmat = tmat / jnp.sum(tmat, axis=1, keepdims=True)
    a = anchor.astype(jnp.float32)
    p = positive.astype(jnp.float32)
    logit = jnp.matmul(a, p.T, precision=lax.Precision.HIGHEST)
    log_sm = jax.nn.log_softmax(logit, axis=-1)
    loss_ce = jnp.mean(jnp.sum(-tmat * log_sm, axis=-1))
    l2 = jnp.sum(a ** 2) / B + jnp.sum(p ** 2) / B
    return loss_ce + l2_reg * l2 * 0.25


if __name__ == "__main__":
    key = jax.random.PRNGKey(0)
    ks = jax.random.split(key, 9)

    # Case 1: one n-pair batch of 8, 32-d embeddings (module-typical small scale).
    B, D = 8, 32
    anchor = jax.random.normal(ks[0], (B, D), dtype=jnp.float32)
    positive = jax.random.normal(ks[1], (B, D), dtype=jnp.float32)
    target = jax.random.randint(ks[2], (B,), 0, 4, dtype=jnp.int32)
    loss = npair_loss(anchor, positive, target)
    jax.block_until_ready(loss)
    ref = npair_loss_ref(anchor, positive, target)
    assert jnp.allclose(loss, ref, rtol=1e-3, atol=1e-3), (loss, ref)

    # Case 2: B not a multiple of the tile -> padding/masking path, many row blocks.
    B2, D2 = 20, 48
    anchor2 = jax.random.normal(ks[3], (B2, D2), dtype=jnp.float32)
    positive2 = jax.random.normal(ks[4], (B2, D2), dtype=jnp.float32)
    target2 = jax.random.randint(ks[5], (B2,), 0, 5, dtype=jnp.int32)
    loss2 = npair_loss(anchor2, positive2, target2, block_rows=8)
    jax.block_until_ready(loss2)
    ref2 = npair_loss_ref(anchor2, positive2, target2)
    assert jnp.allclose(loss2, ref2, rtol=1e-3, atol=1e-3), (loss2, ref2)

    # Case 3: multiple row AND column blocks -> exercises the online-lse accumulation.
    B3, D3 = 300, 64
    anchor3 = jax.random.normal(ks[6], (B3, D3), dtype=jnp.float32)
    positive3 = jax.random.normal(ks[7], (B3, D3), dtype=jnp.float32)
    target3 = jax.random.randint(ks[8], (B3,), 0, 7, dtype=jnp.int32)
    loss3 = npair_loss(anchor3, positive3, target3, block_rows=128, block_cols=128)
    jax.block_until_ready(loss3)
    ref3 = npair_loss_ref(anchor3, positive3, target3)
    assert jnp.allclose(loss3, ref3, rtol=1e-3, atol=1e-3), (loss3, ref3)

    print("KERNEL_OK")
</pallas_src>

<mosaic_0001>
module attributes {stable_mosaic.version = 11 : i64} {
  func.func @_npair_loss_kernel(%arg0: i32, %arg1: i32, %arg2: memref<128x128xf32, #tpu.memory_space<vmem>>, %arg3: memref<128x128xf32, #tpu.memory_space<vmem>>, %arg4: memref<128x1xi32, #tpu.memory_space<vmem>>, %arg5: memref<1x128xi32, #tpu.memory_space<vmem>>, %arg6: memref<1x8x128xf32, #tpu.memory_space<vmem>>, %arg7: memref<128x1xf32, #tpu.memory_space<vmem>>, %arg8: memref<128x1xf32, #tpu.memory_space<vmem>>, %arg9: memref<128x1xf32, #tpu.memory_space<vmem>>, %arg10: memref<128x1xf32, #tpu.memory_space<vmem>>, %arg11: memref<1x1xf32, #tpu.memory_space<vmem>>) attributes {dimension_semantics = [#tpu.dimension_semantics<parallel>, #tpu.dimension_semantics<arbitrary>], iteration_bounds = array<i64: 1, 1>, scalar_prefetch = 0 : i64, scratch_operands = 5 : i64, tpu.core_type = #tpu.core_type<tc>, window_params = [{transform_indices = @transform_0, window_bounds = array<i64: 128, 128>}, {transform_indices = @transform_1, window_bounds = array<i64: 128, 128>}, {transform_indices = @transform_2, window_bounds = array<i64: 128, 1>}, {transform_indices = @transform_3, window_bounds = array<i64: 1, 128>}, {transform_indices = @transform_4, window_bounds = array<i64: 1, 8, 128>}]} {
    %c0_i32 = arith.constant 0 : i32
    %0 = arith.cmpi eq, %arg1, %c0_i32 : i32
    %1 = arith.extui %0 : i1 to i32
    %c0_i32_0 = arith.constant 0 : i32
    %2 = arith.cmpi ne, %1, %c0_i32_0 : i32
    scf.if %2 {
      %cst_36 = arith.constant -1.000000e+30 : f32
      %60 = vector.broadcast %cst_36 : f32 to vector<128x1xf32>
      %c0_37 = arith.constant 0 : index
      %c0_38 = arith.constant 0 : index
      %61 = vector.load %arg7[%c0_37, %c0_38] : memref<128x1xf32, #tpu.memory_space<vmem>>, vector<128x1xf32>
      tpu.vector_store %arg7[%c0_37, %c0_38], %60 {strides = array<i32>} : memref<128x1xf32, #tpu.memory_space<vmem>>, vector<128x1xf32>,
      %cst_39 = arith.constant 0.000000e+00 : f32
      %62 = vector.broadcast %cst_39 : f32 to vector<128x1xf32>
      %c0_40 = arith.constant 0 : index
      %c0_41 = arith.constant 0 : index
      %63 = vector.load %arg8[%c0_40, %c0_41] : memref<128x1xf32, #tpu.memory_space<vmem>>, vector<128x1xf32>
      tpu.vector_store %arg8[%c0_40, %c0_41], %62 {strides = array<i32>} : memref<128x1xf32, #tpu.memory_space<vmem>>, vector<128x1xf32>,
      %cst_42 = arith.constant 0.000000e+00 : f32
      %64 = vector.broadcast %cst_42 : f32 to vector<128x1xf32>
      %c0_43 = arith.constant 0 : index
      %c0_44 = arith.constant 0 : index
      %65 = vector.load %arg9[%c0_43, %c0_44] : memref<128x1xf32, #tpu.memory_space<vmem>>, vector<128x1xf32>
      tpu.vector_store %arg9[%c0_43, %c0_44], %64 {strides = array<i32>} : memref<128x1xf32, #tpu.memory_space<vmem>>, vector<128x1xf32>,
      %cst_45 = arith.constant 0.000000e+00 : f32
      %66 = vector.broadcast %cst_45 : f32 to vector<128x1xf32>
      %c0_46 = arith.constant 0 : index
      %c0_47 = arith.constant 0 : index
      %67 = vector.load %arg10[%c0_46, %c0_47] : memref<128x1xf32, #tpu.memory_space<vmem>>, vector<128x1xf32>
      tpu.vector_store %arg10[%c0_46, %c0_47], %66 {strides = array<i32>} : memref<128x1xf32, #tpu.memory_space<vmem>>, vector<128x1xf32>,
      %c0_48 = arith.constant 0 : index
      %c0_49 = arith.constant 0 : index
      %68 = vector.load %arg2[%c0_48, %c0_49] : memref<128x128xf32, #tpu.memory_space<vmem>>, vector<128x128xf32>
      %69 = arith.mulf %68, %68 : vector<128x128xf32>
      %70 = vector.shape_cast %69 : vector<128x128xf32> to vector<1x128x128xf32>
      %cst_50 = arith.constant dense<0.000000e+00> : vector<1xf32>
      %71 = vector.multi_reduction <add>, %70, %cst_50 [1, 2] : vector<1x128x128xf32> to vector<1xf32>
      %72 = vector.shape_cast %71 : vector<1xf32> to vector<1x1x1xf32>
      %73 = vector.extract %72[0, 0, 0] : f32 from vector<1x1x1xf32>
      %74 = vector.broadcast %73 : f32 to vector<1x1xf32>
      %c0_51 = arith.constant 0 : index
      %c0_52 = arith.constant 0 : index
      %75 = vector.load %arg11[%c0_51, %c0_52] : memref<1x1xf32, #tpu.memory_space<vmem>>, vector<1x1xf32>
      tpu.vector_store %arg11[%c0_51, %c0_52], %74 {strides = array<i32>} : memref<1x1xf32, #tpu.memory_space<vmem>>, vector<1x1xf32>,
    } else {
    }
    %c0_i32_1 = arith.constant 0 : i32
    %3 = arith.cmpi eq, %arg0, %c0_i32_1 : i32
    %4 = arith.extui %3 : i1 to i32
    %c0_i32_2 = arith.constant 0 : i32
    %5 = arith.cmpi ne, %4, %c0_i32_2 : i32
    scf.if %5 {
      %c0_36 = arith.constant 0 : index
      %c0_37 = arith.constant 0 : index
      %60 = vector.load %arg3[%c0_36, %c0_37] : memref<128x128xf32, #tpu.memory_space<vmem>>, vector<128x128xf32>
      %c0_38 = arith.constant 0 : index
      %c0_39 = arith.constant 0 : index
      %61 = vector.load %arg11[%c0_38, %c0_39] : memref<1x1xf32, #tpu.memory_space<vmem>>, vector<1x1xf32>
      %62 = arith.mulf %60, %60 : vector<128x128xf32>
      %63 = vector.shape_cast %62 : vector<128x128xf32> to vector<1x128x128xf32>
      %cst_40 = arith.constant dense<0.000000e+00> : vector<1xf32>
      %64 = vector.multi_reduction <add>, %63, %cst_40 [1, 2] : vector<1x128x128xf32> to vector<1xf32>
      %65 = vector.shape_cast %64 : vector<1xf32> to vector<1x1x1xf32>
      %66 = vector.extract %65[0, 0, 0] : f32 from vector<1x1x1xf32>
      %67 = vector.broadcast %66 : f32 to vector<1x1xf32>
      %68 = arith.addf %61, %67 : vector<1x1xf32>
      %c0_41 = arith.constant 0 : index
      %c0_42 = arith.constant 0 : index
      %69 = vector.load %arg11[%c0_41, %c0_42] : memref<1x1xf32, #tpu.memory_space<vmem>>, vector<1x1xf32>
      tpu.vector_store %arg11[%c0_41, %c0_42], %68 {strides = array<i32>} : memref<1x1xf32, #tpu.memory_space<vmem>>, vector<1x1xf32>,
    } else {
    }
    %c0 = arith.constant 0 : index
    %c0_3 = arith.constant 0 : index
    %6 = vector.load %arg2[%c0, %c0_3] : memref<128x128xf32, #tpu.memory_space<vmem>>, vector<128x128xf32>
    %c0_4 = arith.constant 0 : index
    %c0_5 = arith.constant 0 : index
    %7 = vector.load %arg3[%c0_4, %c0_5] : memref<128x128xf32, #tpu.memory_space<vmem>>, vector<128x128xf32>
    %cst = arith.constant dense<0.000000e+00> : vector<128x128xf32>
    %8 = tpu.matmul %6, %7, %cst {dimension_numbers = #tpu.dot_dimension_numbers<[1], [1], [0], [0], [0, 0, 1, 0], [], []>} : vector<128x128xf32>, vector<128x128xf32>, vector<128x128xf32> -> vector<128x128xf32>
    %c0_6 = arith.constant 0 : index
    %c0_7 = arith.constant 0 : index
    %9 = vector.load %arg4[%c0_6, %c0_7] : memref<128x1xi32, #tpu.memory_space<vmem>>, vector<128x1xi32>
    %c0_8 = arith.constant 0 : index
    %c0_9 = arith.constant 0 : index
    %10 = vector.load %arg5[%c0_8, %c0_9] : memref<1x128xi32, #tpu.memory_space<vmem>>, vector<1x128xi32>
    %11 = vector.broadcast %9 : vector<128x1xi32> to vector<128x128xi32>
    %12 = vector.broadcast %10 : vector<1x128xi32> to vector<128x128xi32>
    %13 = arith.cmpi eq, %11, %12 : vector<128x128xi32>
    %14 = tpu.iota {dimensions = array<i32: 1>} : vector<1x128xi32>
    %c128_i32 = arith.constant 128 : i32
    %15 = arith.muli %arg1, %c128_i32 : i32
    %16 = vector.broadcast %15 : i32 to vector<1x128xi32>
    %17 = arith.addi %14, %16 : vector<1x128xi32>
    %c8_i32 = arith.constant 8 : i32
    %18 = vector.broadcast %c8_i32 : i32 to vector<1x128xi32>
    %19 = arith.cmpi slt, %17, %18 : vector<1x128xi32>
    %20 = vector.broadcast %19 : vector<1x128xi1> to vector<128x128xi1>
    %21 = arith.andi %13, %20 : vector<128x128xi1>
    %cst_10 = arith.constant -1.000000e+30 : f32
    %22 = vector.shape_cast %19 : vector<1x128xi1> to vector<1x128xi1>
    %23 = vector.broadcast %22 : vector<1x128xi1> to vector<128x128xi1>
    %24 = vector.broadcast %cst_10 : f32 to vector<128x128xf32>
    %25 = arith.select %23, %8, %24 : vector<128x128xi1>, vector<128x128xf32>
    %c0_11 = arith.constant 0 : index
    %c0_12 = arith.constant 0 : index
    %26 = vector.load %arg7[%c0_11, %c0_12] : memref<128x1xf32, #tpu.memory_space<vmem>>, vector<128x1xf32>
    %cst_13 = arith.constant dense<0xFF800000> : vector<128xf32>
    %27 = vector.multi_reduction <maximumf>, %25, %cst_13 [1] : vector<128x128xf32> to vector<128xf32>
    %28 = vector.shape_cast %27 : vector<128xf32> to vector<128x1xf32>
    %29 = arith.maximumf %26, %28 : vector<128x1xf32>
    %30 = arith.subf %26, %29 : vector<128x1xf32>
    %31 = math.exp %30 : vector<128x1xf32>
    %c0_14 = arith.constant 0 : index
    %c0_15 = arith.constant 0 : index
    %32 = vector.load %arg8[%c0_14, %c0_15] : memref<128x1xf32, #tpu.memory_space<vmem>>, vector<128x1xf32>
    %33 = arith.mulf %31, %32 : vector<128x1xf32>
    %34 = vector.broadcast %29 : vector<128x1xf32> to vector<128x128xf32>
    %35 = arith.subf %25, %34 : vector<128x128xf32>
    %36 = math.exp %35 : vector<128x128xf32>
    %cst_16 = arith.constant dense<0.000000e+00> : vector<128xf32>
    %37 = vector.multi_reduction <add>, %36, %cst_16 [1] : vector<128x128xf32> to vector<128xf32>
    %38 = vector.shape_cast %37 : vector<128xf32> to vector<128x1xf32>
    %39 = arith.addf %33, %38 : vector<128x1xf32>
    %c0_17 = arith.constant 0 : index
    %c0_18 = arith.constant 0 : index
    %40 = vector.load %arg8[%c0_17, %c0_18] : memref<128x1xf32, #tpu.memory_space<vmem>>, vector<128x1xf32>
    tpu.vector_store %arg8[%c0_17, %c0_18], %39 {strides = array<i32>} : memref<128x1xf32, #tpu.memory_space<vmem>>, vector<128x1xf32>,
    %c0_19 = arith.constant 0 : index
    %c0_20 = arith.constant 0 : index
    %41 = vector.load %arg7[%c0_19, %c0_20] : memref<128x1xf32, #tpu.memory_space<vmem>>, vector<128x1xf32>
    tpu.vector_store %arg7[%c0_19, %c0_20], %29 {strides = array<i32>} : memref<128x1xf32, #tpu.memory_space<vmem>>, vector<128x1xf32>,
    %c0_21 = arith.constant 0 : index
    %c0_22 = arith.constant 0 : index
    %42 = vector.load %arg9[%c0_21, %c0_22] : memref<128x1xf32, #tpu.memory_space<vmem>>, vector<128x1xf32>
    %cst_23 = arith.constant 0.000000e+00 : f32
    %43 = vector.broadcast %cst_23 : f32 to vector<128x128xf32>
    %44 = arith.select %21, %8, %43 : vector<128x128xi1>, vector<128x128xf32>
    %cst_24 = arith.constant dense<0.000000e+00> : vector<128xf32>
    %45 = vector.multi_reduction <add>, %44, %cst_24 [1] : vector<128x128xf32> to vector<128xf32>
    %46 = vector.shape_cast %45 : vector<128xf32> to vector<128x1xf32>
    %47 = arith.addf %42, %46 : vector<128x1xf32>
    %c0_25 = arith.constant 0 : index
    %c0_26 = arith.constant 0 : index
    %48 = vector.load %arg9[%c0_25, %c0_26] : memref<128x1xf32, #tpu.memory_space<vmem>>, vector<128x1xf32>
    tpu.vector_store %arg9[%c0_25, %c0_26], %47 {strides = array<i32>} : memref<128x1xf32, #tpu.memory_space<vmem>>, vector<128x1xf32>,
    %c0_27 = arith.constant 0 : index
    %c0_28 = arith.constant 0 : index
    %49 = vector.load %arg10[%c0_27, %c0_28] : memref<128x1xf32, #tpu.memory_space<vmem>>, vector<128x1xf32>
    %cst_29 = arith.constant 1.000000e+00 : f32
    %cst_30 = arith.constant 0.000000e+00 : f32
    %50 = vector.broadcast %cst_29 : f32 to vector<128x128xf32>
    %51 = vector.broadcast %cst_30 : f32 to vector<128x128xf32>
    %52 = arith.select %21, %50, %51 : vector<128x128xi1>, vector<128x128xf32>
    %cst_31 = arith.constant dense<0.000000e+00> : vector<128xf32>
    %53 = vector.multi_reduction <add>, %52, %cst_31 [1] : vector<128x128xf32> to vector<128xf32>
    %54 = vector.shape_cast %53 : vector<128xf32> to vector<128x1xf32>
    %55 = arith.addf %49, %54 : vector<128x1xf32>
    %c0_32 = arith.constant 0 : index
    %c0_33 = arith.constant 0 : index
    %56 = vector.load %arg10[%c0_32, %c0_33] : memref<128x1xf32, #tpu.memory_space<vmem>>, vector<128x1xf32>
    tpu.vector_store %arg10[%c0_32, %c0_33], %55 {strides = array<i32>} : memref<128x1xf32, #tpu.memory_space<vmem>>, vector<128x1xf32>,
    %c0_i32_34 = arith.constant 0 : i32
    %57 = arith.cmpi eq, %arg1, %c0_i32_34 : i32
    %58 = arith.extui %57 : i1 to i32
    %c0_i32_35 = arith.constant 0 : i32
    %59 = arith.cmpi ne, %58, %c0_i32_35 : i32
    scf.if %59 {
      %c0_36 = arith.constant 0 : index
      %c0_37 = arith.constant 0 : index
      %60 = vector.load %arg7[%c0_36, %c0_37] : memref<128x1xf32, #tpu.memory_space<vmem>>, vector<128x1xf32>
      %c0_38 = arith.constant 0 : index
      %c0_39 = arith.constant 0 : index
      %61 = vector.load %arg8[%c0_38, %c0_39] : memref<128x1xf32, #tpu.memory_space<vmem>>, vector<128x1xf32>
      %62 = math.log %61 : vector<128x1xf32>
      %63 = arith.addf %60, %62 : vector<128x1xf32>
      %c0_40 = arith.constant 0 : index
      %c0_41 = arith.constant 0 : index
      %64 = vector.load %arg10[%c0_40, %c0_41] : memref<128x1xf32, #tpu.memory_space<vmem>>, vector<128x1xf32>
      %cst_42 = arith.constant 1.000000e+00 : f32
      %65 = vector.broadcast %cst_42 : f32 to vector<128x1xf32>
      %66 = arith.maximumf %64, %65 : vector<128x1xf32>
      %c0_43 = arith.constant 0 : index
      %c0_44 = arith.constant 0 : index
      %67 = vector.load %arg9[%c0_43, %c0_44] : memref<128x1xf32, #tpu.memory_space<vmem>>, vector<128x1xf32>
      %68 = arith.divf %67, %66 : vector<128x1xf32>
      %69 = arith.subf %63, %68 : vector<128x1xf32>
      %70 = tpu.iota {dimensions = array<i32: 0>} : vector<128x1xi32>
      %c128_i32_45 = arith.constant 128 : i32
      %71 = arith.muli %arg0, %c128_i32_45 : i32
      %72 = vector.broadcast %71 : i32 to vector<128x1xi32>
      %73 = arith.addi %70, %72 : vector<128x1xi32>
      %c8_i32_46 = arith.constant 8 : i32
      %74 = vector.broadcast %c8_i32_46 : i32 to vector<128x1xi32>
      %75 = arith.cmpi slt, %73, %74 : vector<128x1xi32>
      %cst_47 = arith.constant 0.000000e+00 : f32
      %76 = vector.broadcast %cst_47 : f32 to vector<128x1xf32>
      %77 = arith.select %75, %69, %76 : vector<128x1xi1>, vector<128x1xf32>
      %cst_48 = arith.constant dense<0.000000e+00> : vector<1xf32>
      %78 = vector.multi_reduction <add>, %77, %cst_48 [0] : vector<128x1xf32> to vector<1xf32>
      %79 = vector.shape_cast %78 : vector<1xf32> to vector<1x1xf32>
      %80 = tpu.iota {dimensions = array<i32: 2>} : vector<1x8x128xi32>
      %81 = tpu.iota {dimensions = array<i32: 1>} : vector<1x8x128xi32>
      %c0_i32_49 = arith.constant 0 : i32
      %82 = vector.broadcast %c0_i32_49 : i32 to vector<1x8x128xi32>
      %83 = arith.cmpi eq, %81, %82 : vector<1x8x128xi32>
      %c0_i32_50 = arith.constant 0 : i32
      %84 = vector.broadcast %c0_i32_50 : i32 to vector<1x8x128xi32>
      %85 = arith.cmpi eq, %80, %84 : vector<1x8x128xi32>
      %86 = arith.andi %83, %85 : vector<1x8x128xi1>
      %cst_51 = arith.constant 0.000000e+00 : f32
      %87 = vector.shape_cast %79 : vector<1x1xf32> to vector<1x1x1xf32>
      %88 = vector.broadcast %87 : vector<1x1x1xf32> to vector<1x8x128xf32>
      %89 = vector.broadcast %cst_51 : f32 to vector<1x8x128xf32>
      %90 = arith.select %86, %88, %89 : vector<1x8x128xi1>, vector<1x8x128xf32>
      %c0_i32_52 = arith.constant 0 : i32
      %91 = vector.broadcast %c0_i32_52 : i32 to vector<1x8x128xi32>
      %92 = arith.cmpi eq, %81, %91 : vector<1x8x128xi32>
      %c1_i32 = arith.constant 1 : i32
      %93 = vector.broadcast %c1_i32 : i32 to vector<1x8x128xi32>
      %94 = arith.cmpi eq, %80, %93 : vector<1x8x128xi32>
      %95 = arith.andi %92, %94 : vector<1x8x128xi1>
      %c0_53 = arith.constant 0 : index
      %c0_54 = arith.constant 0 : index
      %96 = vector.load %arg11[%c0_53, %c0_54] : memref<1x1xf32, #tpu.memory_space<vmem>>, vector<1x1xf32>
      %cst_55 = arith.constant 0.000000e+00 : f32
      %97 = vector.shape_cast %96 : vector<1x1xf32> to vector<1x1x1xf32>
      %98 = vector.broadcast %97 : vector<1x1x1xf32> to vector<1x8x128xf32>
      %99 = vector.broadcast %cst_55 : f32 to vector<1x8x128xf32>
      %100 = arith.select %95, %98, %99 : vector<1x8x128xi1>, vector<1x8x128xf32>
      %101 = arith.addf %90, %100 : vector<1x8x128xf32>
      %c0_56 = arith.constant 0 : index
      %c0_57 = arith.constant 0 : index
      %c0_58 = arith.constant 0 : index
      %102 = vector.load %arg6[%c0_56, %c0_57, %c0_58] : memref<1x8x128xf32, #tpu.memory_space<vmem>>, vector<1x8x128xf32>
      tpu.vector_store %arg6[%c0_56, %c0_57, %c0_58], %101 {strides = array<i32>} : memref<1x8x128xf32, #tpu.memory_space<vmem>>, vector<1x8x128xf32>,
    } else {
    }
    return
  }
  func.func @transform_0(%arg0: i32, %arg1: i32) -> (i32, i32) {
    %c0_i32 = arith.constant 0 : i32
    %c0_i32_0 = arith.constant 0 : i32
    return %arg0, %c0_i32 : i32, i32
  }
  func.func @transform_1(%arg0: i32, %arg1: i32) -> (i32, i32) {
    %c0_i32 = arith.constant 0 : i32
    %c0_i32_0 = arith.constant 0 : i32
    return %arg1, %c0_i32 : i32, i32
  }
  func.func @transform_2(%arg0: i32, %arg1: i32) -> (i32, i32) {
    %c0_i32 = arith.constant 0 : i32
    %c0_i32_0 = arith.constant 0 : i32
    return %arg0, %c0_i32 : i32, i32
  }
  func.func @transform_3(%arg0: i32, %arg1: i32) -> (i32, i32) {
    %c0_i32 = arith.constant 0 : i32
    %c0_i32_0 = arith.constant 0 : i32
    return %c0_i32, %arg1 : i32, i32
  }
  func.func @transform_4(%arg0: i32, %arg1: i32) -> (i32, i32, i32) {
    %c0_i32 = arith.constant 0 : i32
    %c0_i32_0 = arith.constant 0 : i32
    %c0_i32_1 = arith.constant 0 : i32
    return %arg0, %c0_i32, %c0_i32_0 : i32, i32, i32
  }
}

</mosaic_0001>

<bundles_post_ra>
// kernel: tpu_custom_call.1
= control target key start
LH: loop header
LB: loop body
LE: loop exit
PB: predicated region body
PF: predicated region fallthrough
CT: control target
= control target key end

     0   :  { %9 = vsyncpa [#allocation8], 0  ;;  %s2700_s0 = inlined_call_operand.vmem [shape: f32[128,128], index: 0, kind: input, shape index: {}]   ;;  %s2701_s1 = inlined_call_operand.hbm [shape: f32[128,128], index: 1, kind: input, shape index: {}]   ;;  %s2702_s2 = inlined_call_operand.vmem [shape: s32[128,1], index: 2, kind: input, shape index: {}]   ;;  %s2703_s3 = inlined_call_operand.vmem [shape: s32[1,128], index: 3, kind: input, shape index: {}]   ;;  %s2704_s4 = inlined_call_operand.hbm [shape: f32[1,8,128], index: 4, kind: output, shape index: {}]  }
   0x1   :  { %10 = vsyncpa [#allocation9], 0  ;;  %s1641_s15 = smov [#allocation7]  }
   0x2   :  { %s18_s16 = sshll.u32 %s1641_s15, 4  ;;  %s19_s16 = int_to_ptr.vmem [resolvable:$true] %s18_s16 }
   0x3   :  { %s1605_s17 = scalar_lea.vmem %s19_s16, 2048  ;;  %p1610_p1 = scmp.lt.s32.totalorder %s19_s16, %s19_s16 }
   0x4   :  { %p1606_p0 = scmp.ne.s32.totalorder %s19_s16, %s1605_s17  ;;  %p1611_p2 = scmp.lt.s32.totalorder %s1605_s17, %s1605_s17 }
   0x6   :  { %p1612_p3 = por %p1611_p2, %p1610_p1 }
   0x8   :  { %p1613_p4 = pnand %p1612_p3, %p1606_p0 }
   0xa   :  { %1616 = shalt.err (!%p1613_p4)
}
   0xb   :  { %s1642_s18 = smov 128   ;;  %s1643_s19 = smov 8  }
   0xc   :  { %24 = dma.hbm_to_vmem [thread:$0]  %s2701_s1, 2048, %s19_s16, [#allocation8], %s1642_s18, %s1642_s18, %s1643_s19  }
   0xd   :  { %1637 = dma.done.wait [#allocation8], 2048  }
   0xe   :  { %1638 = vsyncadd [#allocation8], 4294965248  ;;  %v1644_v0 = vmov 0   ;;  %v1676_v1 = vld [vmem:[#allocation7 + $0x78] sm:$0xff]  ;;  %v1678_v2 = vld [vmem:[#allocation7 + $0x70] sm:$0xff]  ;;  %vm2734_vm3 = vcmask 7168  }
   0xf   :  { %1527 = vset.pattern.permute.xlu1 %v1644_v0  ;;  %1528 = vset.pattern.permute.xlu0 %v1644_v0  ;;  %v1686_v3 = vld [vmem:[#allocation7 + $0x68] sm:$0xff]  ;;  %v225_v4 = vld [vmem:[%s2700_s0] sm:$0xff]  ;;  %v1717_v11 = vld [vmem:[%s2700_s0 + $0x18] sm:$0xff] }
  0x10   :  { %1428 = vmatprep.subr.mxu0 %v1676_v1  ;;  %1484 = vmatprep.subr.mxu1 %v1676_v1  ;;  %v1694_v5 = vld [vmem:[%s2700_s0 + $0x40] sm:$0xff]  ;;  %v1701_v6 = vld [vmem:[%s2700_s0 + $0x8] sm:$0xff]  ;;  %v1706_v7 = vld [vmem:[%s2700_s0 + $0x10] sm:$0xff]  ;;  %v117_v8 = vmul.f32 %v225_v4, %v225_v4  ;;  %v120_v19 = vmul.f32 %v1717_v11, %v1717_v11 }
  0x11   :  { %1429 = vmatpush3.xpose.msra.mxu0 %v1676_v1  ;;  %1500 = vmatpush3.xpose.msra.mxu1 %v1676_v1  ;;  %v1710_v9 = vld [vmem:[#allocation7 + $0x8] sm:$0xff]  ;;  %v1712_v10 = vld [vmem:[#allocation7] sm:$0xff]  ;;  %v118_v12 = vmul.f32 %v1701_v6, %v1701_v6  ;;  %v119_v13 = vmul.f32 %v1706_v7, %v1706_v7  ;;  %v1735_v18 = vld [vmem:[#allocation7 + $0x10] sm:$0xff]  ;;  %v125_v51 = vmul.f32 %v1694_v5, %v1694_v5 }
  0x12   :  { %1430 = vmatprep.subr.mxu0 %v1678_v2  ;;  %1485 = vmatprep.subr.mxu1 %v1678_v2  ;;  %v1723_v14 = vld [vmem:[#allocation7 + $0x60] sm:$0xff]  ;;  %v181_v16 = vmul.f32 %v1712_v10, %v1712_v10  ;;  %v182_v17 = vmul.f32 %v1710_v9, %v1710_v9  ;;  %v183_v22 = vmul.f32 %v1735_v18, %v1735_v18  ;;  %v1753_v24 = vld [vmem:[#allocation7 + $0x18] sm:$0xff]  ;;  %v1762_v28 = vld [vmem:[%s2700_s0 + $0x30] sm:$0xff] }
  0x13   :  { %1460 = vmatprep.mubr.f32.mxu0 %v225_v4  ;;  %1472 = vmatprep.mubr.f32.mxu1 %v1694_v5  ;;  %v1729_v15 = vld [vmem:[%s2700_s0 + $0x20] sm:$0xff]  ;;  %v133_v20 = vadd.f32 %v118_v12, %v117_v8  ;;  %v1744_v21 = vld [vmem:[%s2700_s0 + $0x28] sm:$0xff]  ;;  %v184_v29 = vmul.f32 %v1753_v24, %v1753_v24  ;;  %v404_v34 = vld [vmem:[%s2702_s2 + $0x10] sm:$0xff]  ;;  %v123_v39 = vmul.f32 %v1762_v28, %v1762_v28 }
  0x14   :  { %v402_v23 = vld [vmem:[%s2702_s2] sm:$0xff]  ;;  %v121_v25 = vmul.f32 %v1729_v15, %v1729_v15  ;;  %v197_v30 = vadd.f32 %v182_v17, %v181_v16  ;;  %v122_v32 = vmul.f32 %v1744_v21, %v1744_v21  ;;  %v1778_v35 = vld [vmem:[%s2700_s0 + $0x38] sm:$0xff]  ;;  %v1784_v38 = vld [vmem:[#allocation7 + $0x28] sm:$0xff] }
  0x15   :  { %1431 = vmatpush3.xpose.msra.mxu0 %v1678_v2  ;;  %1501 = vmatpush3.xpose.msra.mxu1 %v1678_v2  ;;  %v134_v26 = vadd.f32 %v133_v20, %v119_v13  ;;  %v1757_v27 = vld [vmem:[#allocation7 + $0x58] sm:$0xff]  ;;  %v1766_v31 = vld [vmem:[#allocation7 + $0x20] sm:$0xff]  ;;  %v251_v41 = vld [vmem:[#allocation7 + $0x50] sm:$0xff]  ;;  %v186_v42 = vmul.f32 %v1784_v38, %v1784_v38  ;;  %v124_v45 = vmul.f32 %v1778_v35, %v1778_v35 }
  0x16   :  { %1432 = vmatprep.subr.mxu0 %v1686_v3  ;;  %1486 = vmatprep.subr.mxu1 %v1686_v3  ;;  %v185_v36 = vmul.f32 %v1766_v31, %v1766_v31  ;;  %v198_v37 = vadd.f32 %v197_v30, %v183_v22  ;;  %v1790_v44 = vld [vmem:[#allocation7 + $0x30] sm:$0xff]  ;;  %v407_v47 = vld [vmem:[%s2702_s2 + $0x28] sm:$0xff]  ;;  %v248_v50 = vld [vmem:[#allocation7 + $0x38] sm:$0xff] }
  0x17   :  { %420 = vperm.xlu1 %1527, %v402_v23   ;;  %v135_v33 = vadd.f32 %v134_v26, %v120_v19  ;;  %v187_v48 = vmul.f32 %v1790_v44, %v1790_v44  ;;  %v250_v53 = vld [vmem:[#allocation7 + $0x48] sm:$0xff]  ;;  %v188_v55 = vmul.f32 %v248_v50, %v248_v50  ;;  %v249_v57 = vld [vmem:[#allocation7 + $0x40] sm:$0xff]  ;;  %v409_v60 = vld [vmem:[%s2702_s2 + $0x38] sm:$0xff]  ;;  %v191_v19 = vmul.f32 %v251_v41, %v251_v41 }
  0x18   :  { %v199_v43 = vadd.f32 %v198_v37, %v184_v29  ;;  %v1806_v54 = vld [vmem:[%s2700_s0 + $0x48] sm:$0xff]  ;;  %v1816_v61 = vld [vmem:[%s2700_s0 + $0x50] sm:$0xff]  ;;  %v189_v62 = vmul.f32 %v249_v57, %v249_v57  ;;  %v1823_v5 = vld [vmem:[%s2700_s0 + $0x58] sm:$0xff]  ;;  %v190_v8 = vmul.f32 %v250_v53, %v250_v53  ;;  %v192_v26 = vmul.f32 %v1757_v27, %v1757_v27 }
  0x19   :  { %1433 = vmatpush3.xpose.msra.mxu0 %v1686_v3  ;;  %1502 = vmatpush3.xpose.msra.mxu1 %v1686_v3  ;;  %v136_v40 = vadd.f32 %v135_v33, %v121_v25  ;;  %v126_v58 = vmul.f32 %v1806_v54, %v1806_v54  ;;  %v127_v0 = vmul.f32 %v1816_v61, %v1816_v61  ;;  %v1830_v17 = vld [vmem:[%s2700_s0 + $0x60] sm:$0xff]  ;;  %v1837_v25 = vld [vmem:[%s2700_s0 + $0x68] sm:$0xff]  ;;  %v1846_v33 = vld [vmem:[%s2700_s0 + $0x70] sm:$0xff] }
  0x1a   :  { %1434 = vmatprep.subr.mxu0 %v1723_v14  ;;  %1487 = vmatprep.subr.mxu1 %v1723_v14  ;;  %v200_v49 = vadd.f32 %v199_v43, %v185_v36  ;;  %v128_v13 = vmul.f32 %v1823_v5, %v1823_v5  ;;  %v129_v22 = vmul.f32 %v1830_v17, %v1830_v17 }
  0x1b   :  { %426 = vperm.xlu1 %1527, %v404_v34   ;;  %v137_v46 = vadd.f32 %v136_v40, %v122_v32  ;;  %v130_v30 = vmul.f32 %v1837_v25, %v1837_v25  ;;  %v193_v34 = vmul.f32 %v1723_v14, %v1723_v14  ;;  %v194_v40 = vmul.f32 %v1686_v3, %v1686_v3 }
  0x1c   :  { %v201_v56 = vadd.f32 %v200_v49, %v186_v42  ;;  %v195_v43 = vmul.f32 %v1678_v2, %v1678_v2 }
  0x1d   :  { %1435 = vmatpush3.xpose.msra.mxu0 %v1723_v14  ;;  %1503 = vmatpush3.xpose.msra.mxu1 %v1723_v14  ;;  %v138_v52 = vadd.f32 %v137_v46, %v123_v39  ;;  %v1855_v39 = vld [vmem:[%s2700_s0 + $0x78] sm:$0xff] }
  0x1e   :  { %1436 = vmatprep.subr.mxu0 %v1757_v27  ;;  %1488 = vmatprep.subr.mxu1 %v1757_v27  ;;  %v202_v63 = vadd.f32 %v201_v56, %v187_v48  ;;  %v132_v42 = vmul.f32 %v1855_v39, %v1855_v39 }
  0x1f   :  { %435 = vperm.xlu1 %1527, %v407_v47   ;;  %v139_v59 = vadd.f32 %v138_v52, %v124_v45  ;;  %v196_v47 = vmul.f32 %v1676_v1, %v1676_v1  ;;  %v403_v1 = vld [vmem:[%s2702_s2 + $0x8] sm:$0xff] }
  0x20   :  { %v203_v12 = vadd.f32 %v202_v63, %v188_v55 }
  0x21   :  { %1437 = vmatpush3.xpose.msra.mxu0 %v1757_v27  ;;  %1504 = vmatpush3.xpose.msra.mxu1 %v1757_v27  ;;  %v140_v4 = vadd.f32 %v139_v59, %v125_v51  ;;  %v131_v27 = vmul.f32 %v1846_v33, %v1846_v33  ;;  %v1646_v51 = vmov -1e+30  }
  0x22   :  { %1438 = vmatprep.subr.mxu0 %v251_v41  ;;  %1489 = vmatprep.subr.mxu1 %v251_v41  ;;  %v204_v20 = vadd.f32 %v203_v12, %v189_v62  ;;  %38 = vst.msk [vmem:[#allocation2 + $0x8] sm:$0xff] %vm2734_vm3, %v1646_v51  ;;  %37 = vst.msk [vmem:[#allocation2] sm:$0xff] %vm2734_vm3, %v1646_v51  ;;  %v2743_v12 = vmov 0 }
  0x23   :  { %441 = vperm.xlu1 %1527, %v409_v60   ;;  %v141_v16 = vadd.f32 %v140_v4, %v126_v58  ;;  %39 = vst.msk [vmem:[#allocation2 + $0x10] sm:$0xff] %vm2734_vm3, %v1646_v51  ;;  %40 = vst.msk [vmem:[#allocation2 + $0x18] sm:$0xff] %vm2734_vm3, %v1646_v51 }
  0x24   :  { %v205_v29 = vadd.f32 %v204_v20, %v190_v8  ;;  %41 = vst.msk [vmem:[#allocation2 + $0x20] sm:$0xff] %vm2734_vm3, %v1646_v51  ;;  %42 = vst.msk [vmem:[#allocation2 + $0x28] sm:$0xff] %vm2734_vm3, %v1646_v51 }
  0x25   :  { %1439 = vmatpush3.xpose.msra.mxu0 %v251_v41  ;;  %1505 = vmatpush3.xpose.msra.mxu1 %v251_v41  ;;  %v142_v23 = vadd.f32 %v141_v16, %v127_v0  ;;  %43 = vst.msk [vmem:[#allocation2 + $0x30] sm:$0xff] %vm2734_vm3, %v1646_v51  ;;  %44 = vst.msk [vmem:[#allocation2 + $0x38] sm:$0xff] %vm2734_vm3, %v1646_v51 }
  0x26   :  { %1440 = vmatprep.subr.mxu0 %v250_v53  ;;  %1490 = vmatprep.subr.mxu1 %v250_v53  ;;  %v206_v36 = vadd.f32 %v205_v29, %v191_v19  ;;  %45 = vst.msk [vmem:[#allocation2 + $0x40] sm:$0xff] %vm2734_vm3, %v1646_v51  ;;  %46 = vst.msk [vmem:[#allocation2 + $0x48] sm:$0xff] %vm2734_vm3, %v1646_v51 }
  0x27   :  { %v143_v32 = vadd.f32 %v142_v23, %v128_v13  ;;  %47 = vst.msk [vmem:[#allocation2 + $0x50] sm:$0xff] %vm2734_vm3, %v1646_v51  ;;  %48 = vst.msk [vmem:[#allocation2 + $0x58] sm:$0xff] %vm2734_vm3, %v1646_v51 }
  0x28   :  { %v207_v41 = vadd.f32 %v206_v36, %v192_v26  ;;  %49 = vst.msk [vmem:[#allocation2 + $0x60] sm:$0xff] %vm2734_vm3, %v1646_v51  ;;  %50 = vst.msk [vmem:[#allocation2 + $0x68] sm:$0xff] %vm2734_vm3, %v1646_v51 }
  0x29   :  { %1441 = vmatpush3.xpose.msra.mxu0 %v250_v53  ;;  %1506 = vmatpush3.xpose.msra.mxu1 %v250_v53  ;;  %v144_v37 = vadd.f32 %v143_v32, %v129_v22  ;;  %51 = vst.msk [vmem:[#allocation2 + $0x70] sm:$0xff] %vm2734_vm3, %v1646_v51  ;;  %52 = vst.msk [vmem:[#allocation2 + $0x78] sm:$0xff] %vm2734_vm3, %v1646_v51 }
  0x2a   :  { %1442 = vmatprep.subr.mxu0 %v249_v57  ;;  %1491 = vmatprep.subr.mxu1 %v249_v57  ;;  %v208_v45 = vadd.f32 %v207_v41, %v193_v34 }
  0x2b   :  { %v145_v14 = vadd.f32 %v144_v37, %v130_v30 }
  0x2c   :  { %v209_v3 = vadd.f32 %v208_v45, %v194_v40 }
  0x2d   :  { %1443 = vmatpush3.xpose.msra.mxu0 %v249_v57  ;;  %1507 = vmatpush3.xpose.msra.mxu1 %v249_v57  ;;  %v146_v46 = vadd.f32 %v145_v14, %v131_v27  ;;  %v2366_v27 = vld [vmem:[#allocation2 + $0x10] sm:$0xff] }
  0x2e   :  { %1444 = vmatprep.subr.mxu0 %v248_v50  ;;  %1492 = vmatprep.subr.mxu1 %v248_v50  ;;  %v210_v49 = vadd.f32 %v209_v3, %v195_v43  ;;  %2769 = vst [vmem:[#allocation23_spill] sm:$0xff] %v2366_v27 }
  0x2f   :  { %v147_v48 = vadd.f32 %v146_v46, %v132_v42 }
  0x30   :  { %v211_v2 = vadd.f32 %v210_v49, %v196_v47 }
  0x31   :  { %1445 = vmatpush3.xpose.msra.mxu0 %v248_v50  ;;  %1508 = vmatpush3.xpose.msra.mxu1 %v248_v50 }
  0x32   :  { %1446 = vmatprep.subr.mxu0 %v1790_v44  ;;  %1493 = vmatprep.subr.mxu1 %v1790_v44 }
  0x33   :  { %148 = vadd.xlane.f32.xlu0 %v147_v48 }
  0x35   :  { %1447 = vmatpush3.xpose.msra.mxu0 %v1790_v44  ;;  %1509 = vmatpush3.xpose.msra.mxu1 %v1790_v44  ;;  %v2706_v44 = vmov 0.0  }
  0x36   :  { %1448 = vmatprep.subr.mxu0 %v1784_v38  ;;  %1494 = vmatprep.subr.mxu1 %v1784_v38  ;;  %85 = vst.msk [vmem:[#allocation5] sm:$0xff] %vm2734_vm3, %v2706_v44  ;;  %53 = vst.msk [vmem:[#allocation3] sm:$0xff] %vm2734_vm3, %v2706_v44 }
  0x37   :  { %212 = vadd.xlane.f32.xlu0 %v211_v2  ;;  %54 = vst.msk [vmem:[#allocation3 + $0x8] sm:$0xff] %vm2734_vm3, %v2706_v44  ;;  %55 = vst.msk [vmem:[#allocation3 + $0x10] sm:$0xff] %vm2734_vm3, %v2706_v44  ;;  %v2352_v2 = vld [vmem:[#allocation2 + $0x20] sm:$0xff] }
  0x38   :  { %56 = vst.msk [vmem:[#allocation3 + $0x18] sm:$0xff] %vm2734_vm3, %v2706_v44  ;;  %57 = vst.msk [vmem:[#allocation3 + $0x20] sm:$0xff] %vm2734_vm3, %v2706_v44 }
  0x39   :  { %1449 = vmatpush3.xpose.msra.mxu0 %v1784_v38  ;;  %1510 = vmatpush3.xpose.msra.mxu1 %v1784_v38  ;;  %58 = vst.msk [vmem:[#allocation3 + $0x28] sm:$0xff] %vm2734_vm3, %v2706_v44  ;;  %59 = vst.msk [vmem:[#allocation3 + $0x30] sm:$0xff] %vm2734_vm3, %v2706_v44 }
  0x3a   :  { %1450 = vmatprep.subr.mxu0 %v1766_v31  ;;  %1495 = vmatprep.subr.mxu1 %v1766_v31  ;;  %60 = vst.msk [vmem:[#allocation3 + $0x38] sm:$0xff] %vm2734_vm3, %v2706_v44  ;;  %61 = vst.msk [vmem:[#allocation3 + $0x40] sm:$0xff] %vm2734_vm3, %v2706_v44 }
  0x3b   :  { %62 = vst.msk [vmem:[#allocation3 + $0x48] sm:$0xff] %vm2734_vm3, %v2706_v44  ;;  %63 = vst.msk [vmem:[#allocation3 + $0x50] sm:$0xff] %vm2734_vm3, %v2706_v44 }
  0x3c   :  { %64 = vst.msk [vmem:[#allocation3 + $0x58] sm:$0xff] %vm2734_vm3, %v2706_v44  ;;  %65 = vst.msk [vmem:[#allocation3 + $0x60] sm:$0xff] %vm2734_vm3, %v2706_v44 }
  0x3d   :  { %1451 = vmatpush3.xpose.msra.mxu0 %v1766_v31  ;;  %1511 = vmatpush3.xpose.msra.mxu1 %v1766_v31  ;;  %v1940_v31 = vld [vmem:[%s2703_s3] ss:$0 sm:$0xff]  ;;  %66 = vst.msk [vmem:[#allocation3 + $0x68] sm:$0xff] %vm2734_vm3, %v2706_v44  ;;  %67 = vst.msk [vmem:[#allocation3 + $0x70] sm:$0xff] %vm2734_vm3, %v2706_v44 }
  0x3e   :  { %1452 = vmatprep.subr.mxu0 %v1753_v24  ;;  %1496 = vmatprep.subr.mxu1 %v1753_v24  ;;  %68 = vst.msk [vmem:[#allocation3 + $0x78] sm:$0xff] %vm2734_vm3, %v2706_v44  ;;  %69 = vst.msk [vmem:[#allocation4] sm:$0xff] %vm2734_vm3, %v2706_v44 }
  0x3f   :  { %70 = vst.msk [vmem:[#allocation4 + $0x8] sm:$0xff] %vm2734_vm3, %v2706_v44  ;;  %71 = vst.msk [vmem:[#allocation4 + $0x10] sm:$0xff] %vm2734_vm3, %v2706_v44 }
  0x40   :  { %72 = vst.msk [vmem:[#allocation4 + $0x18] sm:$0xff] %vm2734_vm3, %v2706_v44  ;;  %73 = vst.msk [vmem:[#allocation4 + $0x20] sm:$0xff] %vm2734_vm3, %v2706_v44 }
  0x41   :  { %1453 = vmatpush3.xpose.msra.mxu0 %v1753_v24  ;;  %1512 = vmatpush3.xpose.msra.mxu1 %v1753_v24  ;;  %v2705_v24 = vlaneseq  ;;  %74 = vst.msk [vmem:[#allocation4 + $0x28] sm:$0xff] %vm2734_vm3, %v2706_v44  ;;  %75 = vst.msk [vmem:[#allocation4 + $0x30] sm:$0xff] %vm2734_vm3, %v2706_v44 }
  0x42   :  { %1454 = vmatprep.subr.mxu0 %v1735_v18  ;;  %1497 = vmatprep.subr.mxu1 %v1735_v18  ;;  %76 = vst.msk [vmem:[#allocation4 + $0x38] sm:$0xff] %vm2734_vm3, %v2706_v44  ;;  %77 = vst.msk [vmem:[#allocation4 + $0x40] sm:$0xff] %vm2734_vm3, %v2706_v44 }
  0x43   :  { %78 = vst.msk [vmem:[#allocation4 + $0x48] sm:$0xff] %vm2734_vm3, %v2706_v44  ;;  %79 = vst.msk [vmem:[#allocation4 + $0x50] sm:$0xff] %vm2734_vm3, %v2706_v44 }
  0x44   :  { %80 = vst.msk [vmem:[#allocation4 + $0x58] sm:$0xff] %vm2734_vm3, %v2706_v44  ;;  %81 = vst.msk [vmem:[#allocation4 + $0x60] sm:$0xff] %vm2734_vm3, %v2706_v44 }
  0x45   :  { %1455 = vmatpush3.xpose.msra.mxu0 %v1735_v18  ;;  %1513 = vmatpush3.xpose.msra.mxu1 %v1735_v18  ;;  %v415_v18 = vld [vmem:[%s2702_s2 + $0x68] sm:$0xff]  ;;  %82 = vst.msk [vmem:[#allocation4 + $0x68] sm:$0xff] %vm2734_vm3, %v2706_v44  ;;  %83 = vst.msk [vmem:[#allocation4 + $0x70] sm:$0xff] %vm2734_vm3, %v2706_v44 }
  0x46   :  { %1456 = vmatprep.subr.mxu0 %v1710_v9  ;;  %1498 = vmatprep.subr.mxu1 %v1710_v9  ;;  %84 = vst.msk [vmem:[#allocation4 + $0x78] sm:$0xff] %vm2734_vm3, %v2706_v44  ;;  %86 = vst.msk [vmem:[#allocation5 + $0x8] sm:$0xff] %vm2734_vm3, %v2706_v44 }
  0x47   :  { %87 = vst.msk [vmem:[#allocation5 + $0x10] sm:$0xff] %vm2734_vm3, %v2706_v44  ;;  %88 = vst.msk [vmem:[#allocation5 + $0x18] sm:$0xff] %vm2734_vm3, %v2706_v44 }
  0x48   :  { %89 = vst.msk [vmem:[#allocation5 + $0x20] sm:$0xff] %vm2734_vm3, %v2706_v44  ;;  %90 = vst.msk [vmem:[#allocation5 + $0x28] sm:$0xff] %vm2734_vm3, %v2706_v44 }
  0x49   :  { %1457 = vmatpush3.xpose.msra.mxu0 %v1710_v9  ;;  %1514 = vmatpush3.xpose.msra.mxu1 %v1710_v9  ;;  %v405_v9 = vld [vmem:[%s2702_s2 + $0x18] sm:$0xff]  ;;  %91 = vst.msk [vmem:[#allocation5 + $0x30] sm:$0xff] %vm2734_vm3, %v2706_v44  ;;  %92 = vst.msk [vmem:[#allocation5 + $0x38] sm:$0xff] %vm2734_vm3, %v2706_v44 }
  0x4a   :  { %1458 = vmatprep.subr.mxu0 %v1712_v10  ;;  %1499 = vmatprep.subr.mxu1 %v1712_v10  ;;  %93 = vst.msk [vmem:[#allocation5 + $0x40] sm:$0xff] %vm2734_vm3, %v2706_v44  ;;  %94 = vst.msk [vmem:[#allocation5 + $0x48] sm:$0xff] %vm2734_vm3, %v2706_v44 }
  0x4b   :  { %95 = vst.msk [vmem:[#allocation5 + $0x50] sm:$0xff] %vm2734_vm3, %v2706_v44  ;;  %96 = vst.msk [vmem:[#allocation5 + $0x58] sm:$0xff] %vm2734_vm3, %v2706_v44 }
  0x4c   :  { %97 = vst.msk [vmem:[#allocation5 + $0x60] sm:$0xff] %vm2734_vm3, %v2706_v44  ;;  %98 = vst.msk [vmem:[#allocation5 + $0x68] sm:$0xff] %vm2734_vm3, %v2706_v44 }
  0x4d   :  { %1459 = vmatpush3.xpose.msra.mxu0 %v1712_v10  ;;  %1515 = vmatpush3.xpose.msra.mxu1 %v1712_v10  ;;  %v410_v10 = vld [vmem:[%s2702_s2 + $0x40] sm:$0xff]  ;;  %99 = vst.msk [vmem:[#allocation5 + $0x70] sm:$0xff] %vm2734_vm3, %v2706_v44  ;;  %100 = vst.msk [vmem:[#allocation5 + $0x78] sm:$0xff] %vm2734_vm3, %v2706_v44 }
  0x4e   :  { %423 = vperm.xlu0 %1528, %v403_v1   ;;  %v880_v1 = vld [vmem:[#allocation4] sm:$0xff]  ;;  %2767 = vst [vmem:[#allocation21_spill] sm:$0xff] %v2352_v2 }
  0x50   :  { %1461 = vmatmul.mubr.f32.vlgmr.msra.gmra.mxu0 %v1701_v6  ;;  %1473 = vmatmul.mubr.f32.vlgmr.msra.gmra.mxu1 %v1806_v54  ;;  %v406_v6 = vld [vmem:[%s2702_s2 + $0x20] sm:$0xff] }
  0x51   :  { %1463 = vmatprep.mubr.f32.mxu0 %v1706_v7  ;;  %1475 = vmatprep.mubr.f32.mxu1 %v1816_v61  ;;  %v408_v7 = vld [vmem:[%s2702_s2 + $0x30] sm:$0xff] }
  0x52   :  { %429 = vperm.xlu0 %1528, %v405_v9  }
  0x54   :  { %1464 = vmatmul.mubr.f32.gmra.mxu0 %v1717_v11  ;;  %1476 = vmatmul.mubr.f32.gmra.mxu1 %v1823_v5  ;;  %v411_v11 = vld [vmem:[%s2702_s2 + $0x48] sm:$0xff] }
  0x55   :  { %1466 = vmatprep.mubr.f32.mxu0 %v1729_v15  ;;  %1478 = vmatprep.mubr.f32.mxu1 %v1830_v17  ;;  %v413_v15 = vld [vmem:[%s2702_s2 + $0x58] sm:$0xff] }
  0x56   :  { %432 = vperm.xlu0 %1528, %v406_v6  }
  0x58   :  { %1467 = vmatmul.mubr.f32.gmra.mxu0 %v1744_v21  ;;  %1479 = vmatmul.mubr.f32.gmra.mxu1 %v1837_v25  ;;  %v417_v21 = vld [vmem:[%s2702_s2 + $0x78] sm:$0xff] }
  0x59   :  { %1469 = vmatprep.mubr.f32.mxu0 %v1762_v28  ;;  %1481 = vmatprep.mubr.f32.mxu1 %v1846_v33  ;;  %v1935_v28 = vand.u32 127, %v2705_v24 }
  0x5a   :  { %438 = vperm.xlu0 %1528, %v408_v7  }
  0x5b   :  { %vm492_vm0 = vcmp.lt.s32.totalorder %v1935_v28, 8 }
  0x5c   :  { %1470 = vmatmul.mubr.f32.gmra.mxu0 %v1778_v35  ;;  %1482 = vmatmul.mubr.f32.gmra.mxu1 %v1855_v39 }
  0x5e   :  { %444 = vperm.xlu0 %1528, %v410_v10  }
  0x62   :  { %447 = vperm.xlu0 %1528, %v411_v11  }
  0x66   :  { %453 = vperm.xlu0 %1528, %v413_v15  }
  0x6a   :  { %459 = vperm.xlu0 %1528, %v415_v18  }
  0x6e   :  { %465 = vperm.xlu0 %1528, %v417_v21  }
  0x92   :  { %v421_v35 = vpop.permute.xlu1 %420 }
  0x93   :  { %vm471_vm1 = vcmp.eq.s32.totalorder %v421_v35, %v1940_v31 }
  0x94   :  { %vm1946_vm2 = vmand %vm471_vm1, %vm492_vm0 }
  0x95   :  { %v992_v50 = vsel %vm1946_vm2, 1.0, %v2706_v44 }
  0x96   :  { %1008 = vadd.xlane.f32.xlu0 %v992_v50  ;;  %v2067_v60 = vpop.permute.xlu1 %426 }
  0x9a   :  { %v436_v17 = vpop.permute.xlu1 %435 }
  0x9b   :  { %vm476_vm13 = vcmp.eq.s32.totalorder %v436_v17, %v1940_v31 }
  0xbc   :  { %v149_v52 = vpop.xlane.xlu0 %148 }
  0xbd   :  { %v150_v62 = vrot.slane %v149_v52, 4 }
  0xbf   :  { %v151_v22 = vadd.f32 %v150_v62, %v149_v52  ;;  %v881_v52 = vld [vmem:[#allocation4 + $0x8] sm:$0xff] }
  0xc0   :  { %v213_v53 = vpop.xlane.xlu0 %212 }
  0xc1   :  { %v214_v40 = vrot.slane %v213_v53, 4  ;;  %v152_v14 = vrot.slane %v151_v22, 2 }
  0xc3   :  { %v153_v3 = vadd.f32 %v152_v14, %v151_v22  ;;  %v215_v9 = vadd.f32 %v214_v40, %v213_v53 }
  0xc5   :  { %v154_v10 = vrot.slane %v153_v3, 1  ;;  %v216_v53 = vrot.slane %v215_v9, 2 }
  0xc7   :  { %v155_v50 = vadd.f32 %v154_v10, %v153_v3 }
  0xc9   :  { %v424_v54 = vpop.permute.xlu0 %423  ;;  %1516 = vpush %v155_v50 }
  0xca   :  { %vm472_vm5 = vcmp.eq.s32.totalorder %v424_v54, %v1940_v31 }
  0xcb   :  { %vm2081_vm9 = vmand %vm472_vm5, %vm492_vm0 }
  0xcd   :  { %v430_v55 = vpop.permute.xlu0 %429 }
  0xce   :  { %vm474_vm7 = vcmp.eq.s32.totalorder %v430_v55, %v1940_v31 }
  0xcf   :  { %vm2105_vm12 = vmand %vm474_vm7, %vm492_vm0 }
  0xd1   :  { %v433_v56 = vpop.permute.xlu0 %432 }
  0xd2   :  { %vm475_vm1 = vcmp.eq.s32.totalorder %v433_v56, %v1940_v31 }
  0xd3   :  { %vm2179_vm7 = vmand %vm475_vm1, %vm492_vm0  ;;  %vm473_vm1 = vcmp.eq.s32.totalorder %v2067_v60, %v1940_v31  ;;  %v412_v60 = vld [vmem:[%s2702_s2 + $0x50] sm:$0xff] }
  0xd5   :  { %v2065_v57 = vpop.permute.xlu0 %438 }
  0xd9   :  { %v445_v58 = vpop.permute.xlu0 %444 }
  0xda   :  { %vm479_vm6 = vcmp.eq.s32.totalorder %v445_v58, %v1940_v31 }
  0xdb   :  { %vm2090_vm11 = vmand %vm479_vm6, %vm492_vm0 }
  0xdc   :  { %v2744_v12 = vsel %vm2090_vm11, 4294967295, %v2743_v12 }
  0xdd   :  { %v448_v59 = vpop.permute.xlu0 %447 }
  0xde   :  { %vm480_vm4 = vcmp.eq.s32.totalorder %v448_v59, %v1940_v31  ;;  %v976_v59 = vld [vmem:[#allocation5] sm:$0xff] }
  0xdf   :  { %vm2075_vm8 = vmand %vm480_vm4, %vm492_vm0 }
  0xe0   :  { %vm2145_vm4 = vmand %vm476_vm13, %vm492_vm0 }
  0xe1   :  { %v454_v61 = vpop.permute.xlu0 %453 }
  0xe2   :  { %vm482_vm10 = vcmp.eq.s32.totalorder %v454_v61, %v1940_v31 }
  0xe3   :  { %vm2121_vm14 = vmand %vm482_vm10, %vm492_vm0  ;;  %vm477_vm10 = vcmp.eq.s32.totalorder %v2065_v57, %v1940_v31  ;;  %v217_v57 = vadd.f32 %v216_v53, %v215_v9 }
  0xe4   :  { %vm2225_vm13 = vmand %vm477_vm10, %vm492_vm0 }
  0xe5   :  { %v460_v4 = vpop.permute.xlu0 %459  ;;  %v218_v61 = vrot.slane %v217_v57, 1 }
  0xe6   :  { %vm484_vm15 = vcmp.eq.s32.totalorder %v460_v4, %v1940_v31 }
  0xe7   :  { %vm2161_vm5 = vmand %vm484_vm15, %vm492_vm0  ;;  %v219_v22 = vadd.f32 %v218_v61, %v217_v57  ;;  %vm158_vm15 = vcmask 0   ;;  %v2302_v57 = vpop.permute.xlu1 %441  ;;  %v2306_v61 = vld [vmem:[#allocation2 + $0x48] sm:$0xff] }
  0xe8   :  { %vm478_vm10 = vcmp.eq.s32.totalorder %v2302_v57, %v1940_v31 }
  0xe9   :  { %v466_v29 = vpop.permute.xlu0 %465  ;;  %1518 = vpush %v219_v22 }
  0xea   :  { %vm486_vm6 = vcmp.eq.s32.totalorder %v466_v29, %v1940_v31 }
  0xfa   :  { %s1517_s3 = spop %1516 }
  0xfb   :  { %v157_v9 = vstv %s1517_s3 }
  0xfc   :  { %159 = vst.msk [vmem:[#allocation6] sm:$0x1] %vm158_vm15, %v157_v9  ;;  %v2314_v9 = vld [vmem:[#allocation2] sm:$0xff] }
  0xfd   :  { %2759 = vst [vmem:[#allocation13_spill] sm:$0xff] %v2314_v9 }
 0x103   :  { %v180_v10 = vld [vmem:[#allocation6] sm:$0x1] }
 0x110   :  { %v1462_v5 = vpop.f32.mrf.mxu0  ;;  %v2086_v8 = vpop.f32.mrf.mxu1 }
 0x111   :  { %v2096_v13 = vsel %vm492_vm0, %v1462_v5, -1e+30  ;;  %v2101_v16 = vsel %vm492_vm0, %v2086_v8, -1e+30  ;;  %v897_v36 = vsel %vm2081_vm9, %v1462_v5, 0.0 }
 0x112   :  { %545 = vmax.xlane.f32.xlu1 %v2096_v13  ;;  %v323_v23 = vpop.f32.mrf.mxu0  ;;  %561 = vmax.xlane.f32.xlu0 %v2101_v16  ;;  %v2114_v25 = vpop.f32.mrf.mxu1 }
 0x113   :  { %v2136_v34 = vsel %vm492_vm0, %v323_v23, -1e+30  ;;  %v2168_v45 = vsel %vm492_vm0, %v2114_v25, -1e+30  ;;  %v896_v49 = vsel %vm1946_vm2, %v323_v23, 0.0  ;;  %vm2202_vm2 = vmand %vm486_vm6, %vm492_vm0 }
 0x114   :  { %v2129_v32 = vpop.f32.mrf.mxu0  ;;  %v2131_v33 = vpop.f32.mrf.mxu1  ;;  %vm2442_vm6 = vmand %vm473_vm1, %vm492_vm0 }
 0x115   :  { %v2209_v15 = vsel %vm492_vm0, %v2129_v32, -1e+30  ;;  %v2237_v54 = vsel %vm492_vm0, %v2131_v33, -1e+30 }
 0x116   :  { %543 = vmax.xlane.f32.xlu1 %v2136_v34  ;;  %914 = vadd.xlane.f32.xlu0 %v897_v36  ;;  %v2153_v41 = vpop.f32.mrf.mxu0  ;;  %v2155_v42 = vpop.f32.mrf.mxu1 }
 0x117   :  { %v2214_v18 = vsel %vm492_vm0, %v2155_v42, -1e+30  ;;  %v2254_v62 = vsel %vm492_vm0, %v2153_v41, -1e+30 }
 0x118   :  { %v2171_v46 = vpop.f32.mrf.mxu0  ;;  %v2173_v47 = vpop.f32.mrf.mxu1 }
 0x119   :  { %v2272_v29 = vsel %vm492_vm0, %v2171_v46, -1e+30  ;;  %v2286_v14 = vsel %vm492_vm0, %v2173_v47, -1e+30 }
 0x11a   :  { %559 = vmax.xlane.f32.xlu1 %v2168_v45  ;;  %912 = vadd.xlane.f32.xlu0 %v896_v49  ;;  %v2192_v6 = vpop.f32.mrf.mxu0  ;;  %v2194_v7 = vpop.f32.mrf.mxu1  ;;  %s1519_s26 = spop %1518 }
 0x11b   :  { %v2242_v55 = vsel %vm492_vm0, %v2192_v6, -1e+30  ;;  %v2259_v4 = vsel %vm492_vm0, %v2194_v7, -1e+30  ;;  %v221_v50 = vstv %s1519_s26 }
 0x11c   :  { %v2219_v35 = vpop.f32.mrf.mxu0  ;;  %v2221_v38 = vpop.f32.mrf.mxu1  ;;  %v222_v53 = vadd.f32 %v221_v50, %v180_v10 }
 0x11d   :  { %v2293_v3 = vsel %vm492_vm0, %v2219_v35, -1e+30  ;;  %v2299_v49 = vsel %vm492_vm0, %v2221_v38, -1e+30 }
 0x11e   :  { %549 = vmax.xlane.f32.xlu0 %v2209_v15  ;;  %563 = vmax.xlane.f32.xlu1 %v2214_v18  ;;  %v2244_v56 = vpop.f32.mrf.mxu0  ;;  %v2274_v36 = vpop.f32.mrf.mxu1  ;;  %224 = vst.msk [vmem:[#allocation6] sm:$0x1] %vm158_vm15, %v222_v53  ;;  %vm2494_vm15 = vmand %vm478_vm10, %vm492_vm0 }
 0x11f   :  { %v1009_v5 = vpop.xlane.xlu0 %1008  ;;  %v2267_v23 = vsel %vm492_vm0, %v2244_v56, -1e+30  ;;  %v2281_v40 = vsel %vm492_vm0, %v2274_v36, -1e+30 }
 0x120   :  { %v1040_v17 = vadd.f32 %v1009_v5, %v976_v59  ;;  %v2304_v59 = vld [vmem:[#allocation2 + $0x8] sm:$0xff] }
 0x122   :  { %565 = vmax.xlane.f32.xlu0 %v2237_v54  ;;  %551 = vmax.xlane.f32.xlu1 %v2242_v55  ;;  %1056 = vst.msk [vmem:[#allocation5] sm:$0xff] %vm2734_vm3, %v1040_v17 }
 0x126   :  { %547 = vmax.xlane.f32.xlu0 %v2254_v62  ;;  %567 = vmax.xlane.f32.xlu1 %v2259_v4 }
 0x12a   :  { %555 = vmax.xlane.f32.xlu1 %v2267_v23  ;;  %553 = vmax.xlane.f32.xlu0 %v2272_v29 }
 0x12e   :  { %571 = vmax.xlane.f32.xlu1 %v2281_v40  ;;  %569 = vmax.xlane.f32.xlu0 %v2286_v14 }
 0x132   :  { %557 = vmax.xlane.f32.xlu0 %v2293_v3 }
 0x136   :  { %573 = vmax.xlane.f32.xlu0 %v2299_v49 }
 0x19b   :  { %v546_v5 = vpop.xlane.xlu1 %545  ;;  %v562_v17 = vpop.xlane.xlu0 %561 }
 0x19c   :  { %v2309_v22 = vmax.f32 %v2304_v59, %v546_v5  ;;  %v2312_v24 = vmax.f32 %v2306_v61, %v562_v17  ;;  %v2323_v5 = vld [vmem:[#allocation2 + $0x40] sm:$0xff] }
 0x19d   :  { %2761 = vst [vmem:[#allocation15_spill] sm:$0xff] %v2323_v5 }
 0x19e   :  { %865 = vst.msk [vmem:[#allocation2 + $0x8] sm:$0xff] %vm2734_vm3, %v2309_v22  ;;  %873 = vst.msk [vmem:[#allocation2 + $0x48] sm:$0xff] %vm2734_vm3, %v2312_v24 }
 0x19f   :  { %v544_v10 = vpop.xlane.xlu1 %543  ;;  %v915_v50 = vpop.xlane.xlu0 %914 }
 0x1a0   :  { %v2321_v53 = vmax.f32 %v2314_v9, %v544_v10  ;;  %v945_v44 = vadd.f32 %v915_v50, %v881_v52  ;;  %v2334_v52 = vld [vmem:[#allocation2 + $0x18] sm:$0xff]  ;;  %v2336_v50 = vld [vmem:[#allocation2 + $0x50] sm:$0xff] }
 0x1a1   :  { %2763 = vst [vmem:[#allocation17_spill] sm:$0xff] %v2334_v52  ;;  %2764 = vst [vmem:[#allocation18_spill] sm:$0xff] %v2336_v50 }
 0x1a2   :  { %2760 = vst [vmem:[#allocation14_spill] sm:$0xff] %v2321_v53  ;;  %864 = vst.msk [vmem:[#allocation2] sm:$0xff] %vm2734_vm3, %v2321_v53  ;;  %673 = vperm.xlu1 %1527, %v2321_v53  }
 0x1a3   :  { %961 = vst.msk [vmem:[#allocation4 + $0x8] sm:$0xff] %vm2734_vm3, %v945_v44  ;;  %v560_v39 = vpop.xlane.xlu1 %559  ;;  %v913_v20 = vpop.xlane.xlu0 %912 }
 0x1a4   :  { %v2332_v30 = vmax.f32 %v2323_v5, %v560_v39  ;;  %v944_v10 = vadd.f32 %v913_v20, %v880_v1  ;;  %v2350_v1 = vld [vmem:[#allocation2 + $0x58] sm:$0xff]  ;;  %v2399_v5 = vld [vmem:[#allocation2 + $0x70] sm:$0xff] }
 0x1a5   :  { %2766 = vst [vmem:[#allocation20_spill] sm:$0xff] %v2350_v1  ;;  %2777 = vst [vmem:[#allocation31_spill] sm:$0xff] %v2399_v5 }
 0x1a6   :  { %2762 = vst [vmem:[#allocation16_spill] sm:$0xff] %v2332_v30  ;;  %872 = vst.msk [vmem:[#allocation2 + $0x40] sm:$0xff] %vm2734_vm3, %v2332_v30  ;;  %713 = vperm.xlu0 %1528, %v2332_v30  }
 0x1a7   :  { %960 = vst.msk [vmem:[#allocation4] sm:$0xff] %vm2734_vm3, %v944_v10  ;;  %v550_v44 = vpop.xlane.xlu0 %549  ;;  %v564_v58 = vpop.xlane.xlu1 %563 }
 0x1a8   :  { %v2345_v39 = vmax.f32 %v2334_v52, %v550_v44  ;;  %v2348_v20 = vmax.f32 %v2336_v50, %v564_v58  ;;  %v2368_v52 = vld [vmem:[#allocation2 + $0x60] sm:$0xff] }
 0x1a9   :  { %2770 = vst [vmem:[#allocation24_spill] sm:$0xff] %v2368_v52 }
 0x1aa   :  { %2765 = vst [vmem:[#allocation19_spill] sm:$0xff] %v2348_v20  ;;  %867 = vst.msk [vmem:[#allocation2 + $0x18] sm:$0xff] %vm2734_vm3, %v2345_v39 }
 0x1ab   :  { %874 = vst.msk [vmem:[#allocation2 + $0x50] sm:$0xff] %vm2734_vm3, %v2348_v20  ;;  %v566_v17 = vpop.xlane.xlu0 %565  ;;  %v552_v21 = vpop.xlane.xlu1 %551 }
 0x1ac   :  { %v2361_v44 = vmax.f32 %v2350_v1, %v566_v17  ;;  %v2364_v58 = vmax.f32 %v2352_v2, %v552_v21  ;;  %v2380_v21 = vld [vmem:[#allocation2 + $0x30] sm:$0xff]  ;;  %v2382_v2 = vld [vmem:[#allocation2 + $0x28] sm:$0xff] }
 0x1ad   :  { %2773 = vst [vmem:[#allocation27_spill] sm:$0xff] %v2380_v21  ;;  %2774 = vst [vmem:[#allocation28_spill] sm:$0xff] %v2382_v2 }
 0x1ae   :  { %2768 = vst [vmem:[#allocation22_spill] sm:$0xff] %v2364_v58  ;;  %875 = vst.msk [vmem:[#allocation2 + $0x58] sm:$0xff] %vm2734_vm3, %v2361_v44 }
 0x1af   :  { %868 = vst.msk [vmem:[#allocation2 + $0x20] sm:$0xff] %vm2734_vm3, %v2364_v58  ;;  %v548_v10 = vpop.xlane.xlu0 %547  ;;  %v568_v50 = vpop.xlane.xlu1 %567 }
 0x1b0   :  { %v2375_v30 = vmax.f32 %v2366_v27, %v548_v10  ;;  %v2378_v17 = vmax.f32 %v2368_v52, %v568_v50  ;;  %v2401_v27 = vld [vmem:[#allocation2 + $0x68] sm:$0xff] }
 0x1b1   :  { %2778 = vst [vmem:[#allocation32_spill] sm:$0xff] %v2401_v27 }
 0x1b2   :  { %2771 = vst [vmem:[#allocation25_spill] sm:$0xff] %v2375_v30  ;;  %2772 = vst [vmem:[#allocation26_spill] sm:$0xff] %v2378_v17  ;;  %683 = vperm.xlu0 %1528, %v2375_v30  }
 0x1b3   :  { %866 = vst.msk [vmem:[#allocation2 + $0x10] sm:$0xff] %vm2734_vm3, %v2375_v30  ;;  %876 = vst.msk [vmem:[#allocation2 + $0x60] sm:$0xff] %vm2734_vm3, %v2378_v17  ;;  %v556_v50 = vpop.xlane.xlu1 %555  ;;  %v554_v10 = vpop.xlane.xlu0 %553  ;;  %v2416_v30 = vld [vmem:[#allocation2 + $0x38] sm:$0xff] }
 0x1b4   :  { %v2394_v53 = vmax.f32 %v2380_v21, %v556_v50  ;;  %v2397_v9 = vmax.f32 %v2382_v2, %v554_v10  ;;  %2781 = vst [vmem:[#allocation35_spill] sm:$0xff] %v2416_v30  ;;  %v2430_v2 = vld [vmem:[#allocation2 + $0x78] sm:$0xff] }
 0x1b5   :  { %2783 = vst [vmem:[#allocation37_spill] sm:$0xff] %v2430_v2 }
 0x1b6   :  { %2775 = vst [vmem:[#allocation29_spill] sm:$0xff] %v2394_v53  ;;  %2776 = vst [vmem:[#allocation30_spill] sm:$0xff] %v2397_v9  ;;  %723 = vperm.xlu0 %1528, %v2348_v20  }
 0x1b7   :  { %870 = vst.msk [vmem:[#allocation2 + $0x30] sm:$0xff] %vm2734_vm3, %v2394_v53  ;;  %869 = vst.msk [vmem:[#allocation2 + $0x28] sm:$0xff] %vm2734_vm3, %v2397_v9  ;;  %v572_v50 = vpop.xlane.xlu1 %571  ;;  %v570_v21 = vpop.xlane.xlu0 %569 }
 0x1b8   :  { %v2411_v10 = vmax.f32 %v2399_v5, %v572_v50  ;;  %v2414_v52 = vmax.f32 %v2401_v27, %v570_v21 }
 0x1ba   :  { %2779 = vst [vmem:[#allocation33_spill] sm:$0xff] %v2411_v10  ;;  %2780 = vst [vmem:[#allocation34_spill] sm:$0xff] %v2414_v52  ;;  %733 = vperm.xlu0 %1528, %v2378_v17  }
 0x1bb   :  { %878 = vst.msk [vmem:[#allocation2 + $0x70] sm:$0xff] %vm2734_vm3, %v2411_v10  ;;  %877 = vst.msk [vmem:[#allocation2 + $0x68] sm:$0xff] %vm2734_vm3, %v2414_v52  ;;  %v558_v50 = vpop.xlane.xlu0 %557 }
 0x1bc   :  { %v2428_v21 = vmax.f32 %v2416_v30, %v558_v50  ;;  %v898_v50 = vsel %vm2442_vm6, %v2153_v41, 0.0 }
 0x1be   :  { %2782 = vst [vmem:[#allocation36_spill] sm:$0xff] %v2428_v21  ;;  %743 = vperm.xlu0 %1528, %v2411_v10   ;;  %871 = vst.msk [vmem:[#allocation2 + $0x38] sm:$0xff] %vm2734_vm3, %v2428_v21  ;;  %v416_v10 = vld [vmem:[%s2702_s2 + $0x70] sm:$0xff] }
 0x1bf   :  { %v574_v20 = vpop.xlane.xlu0 %573 }
 0x1c0   :  { %v2438_v1 = vmax.f32 %v2430_v2, %v574_v20  ;;  %v414_v20 = vld [vmem:[%s2702_s2 + $0x60] sm:$0xff]  ;;  %s1647_s2 = smov [#allocation10]  }
 0x1c1   :  { %s1385_s7 = sshll.u32 %s1647_s2, 4  ;;  %s1386_s7 = int_to_ptr.vmem [resolvable:$true] %s1385_s7 }
 0x1c2   :  { %2784 = vst [vmem:[#allocation38_spill] sm:$0xff] %v2438_v1  ;;  %879 = vst.msk [vmem:[#allocation2 + $0x78] sm:$0xff] %vm2734_vm3, %v2438_v1  ;;  %s1617_s0 = scalar_lea.vmem %s1386_s7, 128  ;;  %p1622_p6 = scmp.lt.s32.totalorder %s1386_s7, %s1386_s7 }
 0x1c3   :  { %p1618_p5 = scmp.ne.s32.totalorder %s1386_s7, %s1617_s0  ;;  %p1623_p7 = scmp.lt.s32.totalorder %s1617_s0, %s1617_s0 }
 0x1c5   :  { %p1624_p8 = por %p1623_p7, %p1622_p6 }
 0x1c6   :  { %916 = vadd.xlane.f32.xlu1 %v898_v50 }
 0x1c7   :  { %p1625_p9 = pnand %p1624_p8, %p1618_p5 }
 0x1d7   :  { %450 = vperm.xlu1 %1527, %v412_v60  }
 0x1db   :  { %456 = vperm.xlu1 %1527, %v414_v20  }
 0x1df   :  { %462 = vperm.xlu1 %1527, %v416_v10   ;;  %v882_v10 = vld [vmem:[#allocation4 + $0x10] sm:$0xff] }
 0x1e3   :  { %678 = vperm.xlu1 %1527, %v2309_v22  }
 0x1e7   :  { %718 = vperm.xlu1 %1527, %v2312_v24  }
 0x1eb   :  { %688 = vperm.xlu1 %1527, %v2345_v39  }
 0x1ef   :  { %728 = vperm.xlu1 %1527, %v2361_v44  }
 0x1f3   :  { %698 = vperm.xlu1 %1527, %v2397_v9  }
 0x1f7   :  { %738 = vperm.xlu1 %1527, %v2414_v52  }
 0x1fb   :  { %693 = vperm.xlu1 %1527, %v2364_v58  }
 0x1ff   :  { %708 = vperm.xlu1 %1527, %v2428_v21  }
 0x203   :  { %748 = vperm.xlu1 %1527, %v2438_v1  }
 0x207   :  { %703 = vperm.xlu1 %1527, %v2394_v53  }
 0x21d   :  { %v674_v41 = vpop.permute.xlu1 %673 }
 0x21e   :  { %v751_v30 = vsub.f32 %v2136_v34, %v674_v41  ;;  %v2787_v34 = vsel %vm2105_vm12, %v2129_v32, 0.0 }
 0x220   :  { %v767_v21 = vmul.f32 1.442695, %v751_v30  ;;  %v2790_v30 = vsel %vm2225_vm13, %v2244_v56, 0.0 }
 0x24f   :  { %v917_v50 = vpop.xlane.xlu1 %916 }
 0x250   :  { %v946_v60 = vadd.f32 %v917_v50, %v882_v10 }
 0x252   :  { %962 = vst.msk [vmem:[#allocation4 + $0x10] sm:$0xff] %vm2734_vm3, %v946_v60 }
 0x253   :  { %v451_v20 = vpop.permute.xlu1 %450 }
 0x254   :  { %vm481_vm1 = vcmp.eq.s32.totalorder %v451_v20, %v1940_v31 }
 0x255   :  { %vm2508_vm3 = vmand %vm481_vm1, %vm492_vm0 }
 0x256   :  { %v906_v57 = vsel %vm2508_vm3, %v2155_v42, 0.0  ;;  %v2799_v42 = vsel %vm2121_vm14, %v2131_v33, 0.0  ;;  %v2803_v33 = vmov 0.0  }
 0x257   :  { %v457_v2 = vpop.permute.xlu1 %456  ;;  %v996_v0 = vsel %vm2179_vm7, 1.0, %v2803_v33  ;;  %v998_v20 = vsel %vm2225_vm13, 1.0, %v2803_v33  ;;  %v999_v48 = vsel %vm2494_vm15, 1.0, %v2803_v33  ;;  %v1001_v51 = vsel %vm2075_vm8, 1.0, %v2803_v33 }
 0x258   :  { %vm483_vm10 = vcmp.eq.s32.totalorder %v457_v2, %v1940_v31  ;;  %v1005_v26 = vsel %vm2161_vm5, 1.0, %v2803_v33  ;;  %v1007_v43 = vsel %vm2202_vm2, 1.0, %v2803_v33 }
 0x25b   :  { %v463_v17 = vpop.permute.xlu1 %462 }
 0x25c   :  { %vm485_vm1 = vcmp.eq.s32.totalorder %v463_v17, %v1940_v31  ;;  %v714_v17 = vpop.permute.xlu0 %713 }
 0x25d   :  { %v759_v5 = vsub.f32 %v2168_v45, %v714_v17 }
 0x25f   :  { %v679_v52 = vpop.permute.xlu1 %678  ;;  %v783_v37 = vmul.f32 1.442695, %v759_v5  ;;  %v592_v5 = vsub.f32 %v2304_v59, %v2309_v22  ;;  %v648_v59 = vld [vmem:[#allocation3 + $0x48] sm:$0xff] }
 0x260   :  { %v752_v27 = vsub.f32 %v2096_v13, %v679_v52  ;;  %v2788_v13 = vsel %vm2179_vm7, %v2192_v6, 0.0  ;;  %v2794_v6 = vmov 0  ;;  %v993_v52 = vsel %vm2081_vm9, 1.0, %v2803_v33 }
 0x261   :  { %v2795_v6 = vsel %vm2508_vm3, 4294967295, %v2794_v6  ;;  %vm2536_vm3 = vmand %vm485_vm1, %vm492_vm0 }
 0x262   :  { %v769_v9 = vmul.f32 1.442695, %v752_v27  ;;  %v903_v27 = vsel %vm2494_vm15, %v2219_v35, 0.0  ;;  %v2796_v35 = vsel %vm2075_vm8, %v2086_v8, 0.0  ;;  %v910_v31 = vsel %vm2536_vm3, %v2274_v36, 0.0 }
 0x263   :  { %v719_v58 = vpop.permute.xlu1 %718  ;;  %v994_v36 = vsel %vm2442_vm6, 1.0, %v2803_v33  ;;  %vm2806_vm9 = vnez %v2795_v6 }
 0x264   :  { %1529 = vpow2.f32 %v769_v9  ;;  %v760_v1 = vsub.f32 %v2101_v16, %v719_v58  ;;  %v2789_v16 = vsel %vm2145_vm4, %v2171_v46, 0.0  ;;  %v2793_v46 = vsel %vm2090_vm11, %v2114_v25, 0.0  ;;  %vm2522_vm11 = vmand %vm483_vm10, %vm492_vm0 }
 0x265   :  { %1531 = vpow2.f32 %v767_v21  ;;  %v908_v9 = vsel %vm2522_vm11, %v2194_v7, 0.0  ;;  %v2802_v7 = vsel %vm2161_vm5, %v2173_v47, 0.0  ;;  %v995_v47 = vsel %vm2105_vm12, 1.0, %v2803_v33  ;;  %v684_v21 = vpop.permute.xlu0 %683 }
 0x266   :  { %v785_v53 = vmul.f32 1.442695, %v760_v1  ;;  %v2804_v1 = vsel %vm2202_vm2, %v2221_v38, 0.0  ;;  %v997_v38 = vsel %vm2145_vm4, 1.0, %v2803_v33  ;;  %vm2805_vm0 = vnez %v2744_v12 }
 0x267   :  { %v689_v56 = vpop.permute.xlu1 %688  ;;  %v1003_v12 = vsel %vm2121_vm14, 1.0, %v2803_v33  ;;  %v1004_v6 = vsel %vm2522_vm11, 1.0, %v2803_v33 }
 0x268   :  { %1533 = vpow2.f32 %v785_v53 }
 0x269   :  { %1535 = vpow2.f32 %v783_v37  ;;  %v2808_v37 = vld [vmem:[#allocation14_spill] sm:$0xff] }
 0x26b   :  { %v729_v2 = vpop.permute.xlu1 %728 }
 0x26c   :  { %v762_v19 = vsub.f32 %v2237_v54, %v729_v2  ;;  %v1000_v54 = vsel %vm2805_vm0, 1.0, %v2803_v33 }
 0x26e   :  { %v789_v45 = vmul.f32 1.442695, %v762_v19  ;;  %v609_v19 = vmul.f32 1.442695, %v592_v5 }
 0x26f   :  { %v699_v53 = vpop.permute.xlu1 %698 }
 0x270   :  { %1537 = vpow2.f32 %v789_v45  ;;  %v640_v45 = vld [vmem:[#allocation3 + $0x8] sm:$0xff] }
 0x271   :  { %v1530_v10 = vpop.eup %1529 }
 0x272   :  { %801 = vadd.xlane.f32.xlu0 %v1530_v10  ;;  %v1532_v50 = vpop.eup %1531  ;;  %v753_v10 = vsub.f32 %v2254_v62, %v684_v21  ;;  %v1395_v21 = vld [vmem:[#allocation6] ss:$0 sm:$0xff] }
 0x273   :  { %v739_v58 = vpop.permute.xlu1 %738 }
 0x274   :  { %v764_v32 = vsub.f32 %v2286_v14, %v739_v58 }
 0x275   :  { %v1534_v60 = vpop.eup %1533 }
 0x276   :  { %799 = vadd.xlane.f32.xlu0 %v1532_v50  ;;  %817 = vadd.xlane.f32.xlu1 %v1534_v60  ;;  %v724_v50 = vpop.permute.xlu0 %723  ;;  %v754_v60 = vsub.f32 %v2209_v15, %v689_v56  ;;  %v756_v15 = vsub.f32 %v2272_v29, %v699_v53  ;;  %v793_v14 = vmul.f32 1.442695, %v764_v32  ;;  %v884_v32 = vld [vmem:[#allocation4 + $0x20] sm:$0xff] }
 0x277   :  { %v694_v41 = vpop.permute.xlu1 %693 }
 0x278   :  { %v773_v62 = vmul.f32 1.442695, %v754_v60  ;;  %v755_v29 = vsub.f32 %v2242_v55, %v694_v41  ;;  %v1006_v55 = vsel %vm2536_vm3, 1.0, %v2803_v33  ;;  %v600_v41 = vsub.f32 %v2306_v61, %v2312_v24 }
 0x279   :  { %vm2810_vm3 = vcmask 7168  }
 0x27a   :  { %918 = vadd.xlane.f32.xlu0 %v2787_v34  ;;  %920 = vadd.xlane.f32.xlu1 %v2788_v13  ;;  %v771_v13 = vmul.f32 1.442695, %v753_v10  ;;  %vm2811_vm8 = vmmov %vm2810_vm3 }
 0x27b   :  { %v709_v34 = vpop.permute.xlu1 %708  ;;  %vm2812_vm11 = vmmov %vm2810_vm3 }
 0x27c   :  { %1539 = vpow2.f32 %v771_v13  ;;  %vm2813_vm12 = vmmov %vm2810_vm3 }
 0x27d   :  { %1541 = vpow2.f32 %v773_v62  ;;  %vm2814_vm14 = vmmov %vm2810_vm3 }
 0x27e   :  { %922 = vadd.xlane.f32.xlu0 %v2789_v16  ;;  %924 = vadd.xlane.f32.xlu1 %v2790_v30  ;;  %v761_v16 = vsub.f32 %v2214_v18, %v724_v50  ;;  %v1002_v30 = vsel %vm2806_vm9, 1.0, %v2803_v33  ;;  %v734_v18 = vpop.permute.xlu0 %733  ;;  %vm2815_vm4 = vmmov %vm2810_vm3 }
 0x27f   :  { %v763_v56 = vsub.f32 %v2259_v4, %v734_v18  ;;  %vm2816_vm5 = vmmov %vm2810_vm3 }
 0x280   :  { %v787_v63 = vmul.f32 1.442695, %v761_v16  ;;  %v639_v16 = vld [vmem:[#allocation3] sm:$0xff]  ;;  %vm2817_vm7 = vmmov %vm2810_vm3 }
 0x281   :  { %v791_v25 = vmul.f32 1.442695, %v763_v56  ;;  %v886_v56 = vld [vmem:[#allocation4 + $0x30] sm:$0xff]  ;;  %vm2818_vm2 = vmmov %vm2810_vm3 }
 0x282   :  { %926 = vadd.xlane.f32.xlu0 %v903_v27  ;;  %928 = vadd.xlane.f32.xlu1 %v2793_v46  ;;  %v749_v27 = vpop.permute.xlu1 %748  ;;  %v777_v46 = vmul.f32 1.442695, %v756_v15  ;;  %1543 = vpow2.f32 %v787_v63  ;;  %v883_v63 = vld [vmem:[#allocation4 + $0x18] sm:$0xff]  ;;  %vm2819_vm13 = vmmov %vm2818_vm2 }
 0x283   :  { %v766_v4 = vsub.f32 %v2299_v49, %v749_v27  ;;  %v1155_v27 = vld [vmem:[#allocation5] sm:$0xff]  ;;  %vm2820_vm6 = vmmov %vm2818_vm2 }
 0x284   :  { %1545 = vpow2.f32 %v777_v46  ;;  %vm2821_vm15 = vmmov %vm2818_vm2 }
 0x285   :  { %1547 = vpow2.f32 %v793_v14  ;;  %v797_v8 = vmul.f32 1.442695, %v766_v4  ;;  %v1171_v14 = vmax.f32 %v1155_v27, 1.0  ;;  %vm2822_vm10 = vmmov %vm2818_vm2 }
 0x286   :  { %930 = vadd.xlane.f32.xlu0 %v2796_v35  ;;  %932 = vadd.xlane.f32.xlu1 %v906_v57  ;;  %v775_v57 = vmul.f32 1.442695, %v755_v29  ;;  %v758_v35 = vsub.f32 %v2293_v3, %v709_v34  ;;  %v704_v2 = vpop.permute.xlu1 %703  ;;  %vm2823_vm1 = vmmov %vm2818_vm2 }
 0x287   :  { %v757_v3 = vsub.f32 %v2267_v23, %v704_v2  ;;  %vm2824_vm0 = vmmov %vm2823_vm1 }
 0x288   :  { %1549 = vpow2.f32 %v775_v57  ;;  %vm2825_vm9 = vmmov %vm2824_vm0 }
 0x289   :  { %1551 = vpow2.f32 %v791_v25  ;;  %v779_v33 = vmul.f32 1.442695, %v757_v3  ;;  %v888_v25 = vld [vmem:[#allocation4 + $0x40] sm:$0xff] }
 0x28a   :  { %934 = vadd.xlane.f32.xlu0 %v2799_v42  ;;  %936 = vadd.xlane.f32.xlu1 %v908_v9  ;;  %v1536_v9 = vpop.eup %1535  ;;  %v781_v42 = vmul.f32 1.442695, %v758_v35 }
 0x28c   :  { %1553 = vpow2.f32 %v781_v42 }
 0x28d   :  { %1555 = vpow2.f32 %v797_v8  ;;  %v890_v8 = vld [vmem:[#allocation4 + $0x50] sm:$0xff] }
 0x28e   :  { %938 = vadd.xlane.f32.xlu0 %v2802_v7  ;;  %940 = vadd.xlane.f32.xlu1 %v910_v31  ;;  %v1538_v31 = vpop.eup %1537  ;;  %v744_v7 = vpop.permute.xlu0 %743  ;;  %1557 = vpow2.f32 %v779_v33 }
 0x28f   :  { %v1540_v53 = vpop.eup %1539  ;;  %v765_v11 = vsub.f32 %v2281_v40, %v744_v7  ;;  %v889_v7 = vld [vmem:[#allocation4 + $0x48] sm:$0xff] }
 0x292   :  { %942 = vadd.xlane.f32.xlu0 %v2804_v1  ;;  %1010 = vadd.xlane.f32.xlu1 %v993_v52  ;;  %v1542_v52 = vpop.eup %1541  ;;  %v795_v1 = vmul.f32 1.442695, %v765_v11 }
 0x293   :  { %v1544_v49 = vpop.eup %1543 }
 0x294   :  { %v1546_v58 = vpop.eup %1545  ;;  %1559 = vpow2.f32 %v795_v1  ;;  %v892_v1 = vld [vmem:[#allocation4 + $0x60] sm:$0xff] }
 0x295   :  { %v1548_v23 = vpop.eup %1547  ;;  %1561 = vpow2.f32 %v609_v19 }
 0x296   :  { %1012 = vadd.xlane.f32.xlu0 %v994_v36  ;;  %1014 = vadd.xlane.f32.xlu1 %v995_v47  ;;  %v1550_v36 = vpop.eup %1549 }
 0x297   :  { %v1552_v47 = vpop.eup %1551 }
 0x299   :  { %v1554_v17 = vpop.eup %1553 }
 0x29a   :  { %1016 = vadd.xlane.f32.xlu0 %v996_v0  ;;  %1018 = vadd.xlane.f32.xlu1 %v997_v38  ;;  %v1556_v40 = vpop.eup %1555 }
 0x29b   :  { %v1558_v0 = vpop.eup %1557 }
 0x29e   :  { %1020 = vadd.xlane.f32.xlu0 %v998_v20  ;;  %1022 = vadd.xlane.f32.xlu1 %v999_v48  ;;  %v625_v20 = vmul.f32 1.442695, %v600_v41  ;;  %v2807_v48 = vld [vmem:[#allocation13_spill] sm:$0xff]  ;;  %v1187_v41 = vld [vmem:[#allocation4] sm:$0xff] }
 0x29f   :  { %v2809_v10 = vsub.f32 %v2807_v48, %v2808_v37  ;;  %v895_v37 = vld [vmem:[#allocation4 + $0x78] sm:$0xff] }
 0x2a0   :  { %1563 = vpow2.f32 %v625_v20 }
 0x2a1   :  { %v1560_v38 = vpop.eup %1559  ;;  %v607_v50 = vmul.f32 1.442695, %v2809_v10  ;;  %v977_v10 = vld [vmem:[#allocation5 + $0x8] sm:$0xff] }
 0x2a2   :  { %1024 = vadd.xlane.f32.xlu0 %v1000_v54  ;;  %1026 = vadd.xlane.f32.xlu1 %v1001_v51  ;;  %v1562_v60 = vpop.eup %1561 }
 0x2a3   :  { %1565 = vpow2.f32 %v607_v50  ;;  %v656_v54 = vmul.f32 %v1562_v60, %v640_v45  ;;  %v1075_v50 = vld [vmem:[#allocation2] sm:$0xff] }
 0x2a4   :  { %1567 = vrcp.f32 %v1171_v14 }
 0x2a6   :  { %1028 = vadd.xlane.f32.xlu0 %v1002_v30  ;;  %1030 = vadd.xlane.f32.xlu1 %v1003_v12 }
 0x2aa   :  { %1032 = vadd.xlane.f32.xlu0 %v1004_v6  ;;  %1034 = vadd.xlane.f32.xlu1 %v1005_v26  ;;  %v885_v26 = vld [vmem:[#allocation4 + $0x28] sm:$0xff] }
 0x2ad   :  { %v1564_v34 = vpop.eup %1563 }
 0x2ae   :  { %1036 = vadd.xlane.f32.xlu0 %v1006_v55  ;;  %1038 = vadd.xlane.f32.xlu1 %v1007_v43  ;;  %v664_v61 = vmul.f32 %v1564_v34, %v648_v59  ;;  %v887_v43 = vld [vmem:[#allocation4 + $0x38] sm:$0xff]  ;;  %v978_v59 = vld [vmem:[#allocation5 + $0x10] sm:$0xff] }
 0x2b0   :  { %v1566_v51 = vpop.eup %1565 }
 0x2b1   :  { %v655_v24 = vmul.f32 %v1566_v51, %v639_v16 }
 0x2b2   :  { %815 = vadd.xlane.f32.xlu0 %v1536_v9  ;;  %821 = vadd.xlane.f32.xlu1 %v1538_v31 }
 0x2b6   :  { %805 = vadd.xlane.f32.xlu0 %v1542_v52  ;;  %803 = vadd.xlane.f32.xlu1 %v1540_v53 }
 0x2ba   :  { %819 = vadd.xlane.f32.xlu0 %v1544_v49  ;;  %809 = vadd.xlane.f32.xlu1 %v1546_v58  ;;  %v891_v49 = vld [vmem:[#allocation4 + $0x58] sm:$0xff] }
 0x2be   :  { %825 = vadd.xlane.f32.xlu1 %v1548_v23  ;;  %807 = vadd.xlane.f32.xlu0 %v1550_v36 }
 0x2c2   :  { %823 = vadd.xlane.f32.xlu0 %v1552_v47  ;;  %813 = vadd.xlane.f32.xlu1 %v1554_v17  ;;  %v893_v17 = vld [vmem:[#allocation4 + $0x68] sm:$0xff] }
 0x2c6   :  { %829 = vadd.xlane.f32.xlu1 %v1556_v40  ;;  %811 = vadd.xlane.f32.xlu0 %v1558_v0  ;;  %v894_v40 = vld [vmem:[#allocation4 + $0x70] sm:$0xff]  ;;  %v1568_v0 = vpop.eup %1567 }
 0x2c7   :  { %v1204_v45 = vmul.f32 %v1568_v0, %v1187_v41  ;;  %v2842_v0 = vld [vmem:[#allocation18_spill] sm:$0xff] }
 0x2c8   :  { %v2845_v41 = vld [vmem:[#allocation22_spill] sm:$0xff] }
 0x2ca   :  { %827 = vadd.xlane.f32.xlu0 %v1560_v38 }
 0x2d7   :  { %1373 = vperm.xlu1 %1527, %v1395_v21  }
 0x2fb   :  { %v802_v13 = vpop.xlane.xlu0 %801 }
 0x2fc   :  { %v832_v22 = vadd.f32 %v802_v13, %v656_v54 }
 0x2fe   :  { %849 = vst.msk [vmem:[#allocation3 + $0x8] sm:$0xff] %vm2810_vm3, %v832_v22  ;;  %v979_v22 = vld [vmem:[#allocation5 + $0x18] sm:$0xff]  ;;  %vm2826_vm3 = vmmov %vm2824_vm0 }
 0x2ff   :  { %v800_v62 = vpop.xlane.xlu0 %799  ;;  %v818_v15 = vpop.xlane.xlu1 %817 }
 0x300   :  { %v831_v30 = vadd.f32 %v800_v62, %v655_v24  ;;  %v840_v12 = vadd.f32 %v818_v15, %v664_v61 }
 0x302   :  { %848 = vst.msk [vmem:[#allocation3] sm:$0xff] %vm2811_vm8, %v831_v30  ;;  %vm2827_vm8 = vmmov %vm2824_vm0 }
 0x303   :  { %857 = vst.msk [vmem:[#allocation3 + $0x48] sm:$0xff] %vm2812_vm11, %v840_v12  ;;  %v919_v18 = vpop.xlane.xlu0 %918  ;;  %v921_v46 = vpop.xlane.xlu1 %920  ;;  %vm2829_vm11 = vmmov %vm2824_vm0 }
 0x304   :  { %v947_v29 = vadd.f32 %v919_v18, %v883_v63  ;;  %v948_v6 = vadd.f32 %v921_v46, %v884_v32  ;;  %v980_v63 = vld [vmem:[#allocation5 + $0x20] sm:$0xff]  ;;  %v981_v32 = vld [vmem:[#allocation5 + $0x28] sm:$0xff] }
 0x305   :  { %v2828_v18 = vld [vmem:[#allocation20_spill] sm:$0xff] }
 0x306   :  { %963 = vst.msk [vmem:[#allocation4 + $0x18] sm:$0xff] %vm2813_vm12, %v947_v29  ;;  %v602_v46 = vsub.f32 %v2828_v18, %v2361_v44  ;;  %vm2830_vm12 = vmmov %vm2824_vm0 }
 0x307   :  { %964 = vst.msk [vmem:[#allocation4 + $0x20] sm:$0xff] %vm2814_vm14, %v948_v6  ;;  %v923_v57 = vpop.xlane.xlu0 %922  ;;  %v925_v35 = vpop.xlane.xlu1 %924  ;;  %vm2835_vm14 = vmmov %vm2824_vm0 }
 0x308   :  { %v949_v2 = vadd.f32 %v923_v57, %v885_v26  ;;  %v950_v55 = vadd.f32 %v925_v35, %v886_v56  ;;  %v2831_v57 = vld [vmem:[#allocation15_spill] sm:$0xff]  ;;  %v2832_v35 = vld [vmem:[#allocation16_spill] sm:$0xff]  ;;  %v629_v44 = vmul.f32 1.442695, %v602_v46 }
 0x309   :  { %v1091_v4 = vld [vmem:[#allocation3] sm:$0xff] }
 0x30a   :  { %965 = vst.msk [vmem:[#allocation4 + $0x28] sm:$0xff] %vm2815_vm4, %v949_v2  ;;  %1569 = vlog2.f32 %v1091_v4  ;;  %v2833_v2 = vsub.f32 %v2831_v57, %v2832_v35  ;;  %v982_v4 = vld [vmem:[#allocation5 + $0x30] sm:$0xff]  ;;  %vm2836_vm4 = vmmov %vm2824_vm0  ;;  %v2863_v57 = vld [vmem:[#allocation27_spill] sm:$0xff] }
 0x30b   :  { %966 = vst.msk [vmem:[#allocation4 + $0x30] sm:$0xff] %vm2816_vm5, %v950_v55  ;;  %v927_v9 = vpop.xlane.xlu0 %926  ;;  %v929_v42 = vpop.xlane.xlu1 %928  ;;  %vm2840_vm5 = vmmov %vm2824_vm0 }
 0x30c   :  { %v951_v3 = vadd.f32 %v927_v9, %v887_v43  ;;  %v952_v31 = vadd.f32 %v929_v42, %v888_v25  ;;  %v623_v55 = vmul.f32 1.442695, %v2833_v2  ;;  %v2834_v43 = vld [vmem:[#allocation17_spill] sm:$0xff]  ;;  %v983_v9 = vld [vmem:[#allocation5 + $0x38] sm:$0xff] }
 0x30d   :  { %v594_v25 = vsub.f32 %v2834_v43, %v2345_v39  ;;  %v2837_v39 = vld [vmem:[#allocation23_spill] sm:$0xff]  ;;  %v990_v2 = vld [vmem:[#allocation5 + $0x70] sm:$0xff] }
 0x30e   :  { %967 = vst.msk [vmem:[#allocation4 + $0x38] sm:$0xff] %vm2817_vm7, %v951_v3  ;;  %1571 = vpow2.f32 %v623_v55  ;;  %vm2841_vm7 = vmmov %vm2824_vm0  ;;  %v991_v55 = vld [vmem:[#allocation5 + $0x78] sm:$0xff] }
 0x30f   :  { %968 = vst.msk [vmem:[#allocation4 + $0x40] sm:$0xff] %vm2818_vm2, %v952_v31  ;;  %v931_v53 = vpop.xlane.xlu0 %930  ;;  %v933_v11 = vpop.xlane.xlu1 %932  ;;  %1573 = vpow2.f32 %v629_v44  ;;  %vm2850_vm2 = vmmov %vm2824_vm0 }
 0x310   :  { %v953_v33 = vadd.f32 %v931_v53, %v889_v7  ;;  %v954_v52 = vadd.f32 %v933_v11, %v890_v8  ;;  %v613_v11 = vmul.f32 1.442695, %v594_v25 }
 0x312   :  { %969 = vst.msk [vmem:[#allocation4 + $0x48] sm:$0xff] %vm2819_vm13, %v953_v33  ;;  %v984_v33 = vld [vmem:[#allocation5 + $0x40] sm:$0xff]  ;;  %1575 = vpow2.f32 %v613_v11  ;;  %vm2851_vm13 = vmmov %vm2824_vm0 }
 0x313   :  { %970 = vst.msk [vmem:[#allocation4 + $0x50] sm:$0xff] %vm2820_vm6, %v954_v52  ;;  %v935_v58 = vpop.xlane.xlu0 %934  ;;  %v937_v23 = vpop.xlane.xlu1 %936  ;;  %v985_v52 = vld [vmem:[#allocation5 + $0x48] sm:$0xff]  ;;  %vm2857_vm6 = vmmov %vm2824_vm0 }
 0x314   :  { %v955_v36 = vadd.f32 %v935_v58, %v891_v49  ;;  %v956_v47 = vadd.f32 %v937_v23, %v892_v1  ;;  %v2838_v1 = vld [vmem:[#allocation25_spill] sm:$0xff] }
 0x315   :  { %v2839_v58 = vsub.f32 %v2837_v39, %v2838_v1 }
 0x316   :  { %971 = vst.msk [vmem:[#allocation4 + $0x58] sm:$0xff] %vm2821_vm15, %v955_v36  ;;  %vm2858_vm15 = vmmov %vm2824_vm0 }
 0x317   :  { %972 = vst.msk [vmem:[#allocation4 + $0x60] sm:$0xff] %vm2822_vm10, %v956_v47  ;;  %v1570_v38 = vpop.eup %1569  ;;  %v939_v21 = vpop.xlane.xlu0 %938  ;;  %v611_v23 = vmul.f32 1.442695, %v2839_v58  ;;  %vm2866_vm10 = vmmov %vm2824_vm0 }
 0x318   :  { %v941_v5 = vpop.xlane.xlu1 %940  ;;  %v957_v19 = vadd.f32 %v939_v21, %v893_v17  ;;  %v1108_v48 = vmul.f32 0.6931472, %v1570_v38  ;;  %v2843_v38 = vld [vmem:[#allocation19_spill] sm:$0xff] }
 0x319   :  { %v958_v20 = vadd.f32 %v941_v5, %v894_v40  ;;  %v2844_v21 = vsub.f32 %v2842_v0, %v2843_v38  ;;  %1577 = vpow2.f32 %v611_v23 }
 0x31a   :  { %973 = vst.msk [vmem:[#allocation4 + $0x68] sm:$0xff] %vm2823_vm1, %v957_v19  ;;  %v1139_v60 = vadd.f32 %v1108_v48, %v1075_v50  ;;  %v2846_v19 = vld [vmem:[#allocation21_spill] sm:$0xff]  ;;  %v2848_v50 = vld [vmem:[#allocation30_spill] sm:$0xff]  ;;  %vm2867_vm1 = vmmov %vm2824_vm0 }
 0x31b   :  { %974 = vst.msk [vmem:[#allocation4 + $0x70] sm:$0xff] %vm2824_vm0, %v958_v20  ;;  %v943_v34 = vpop.xlane.xlu0 %942  ;;  %v627_v5 = vmul.f32 1.442695, %v2844_v21  ;;  %v595_v20 = vsub.f32 %v2846_v19, %v2845_v41  ;;  %v986_v48 = vld [vmem:[#allocation5 + $0x50] sm:$0xff]  ;;  %v1572_v43 = vpop.eup %1571  ;;  %v2869_v21 = vld [vmem:[#allocation31_spill] sm:$0xff] }
 0x31c   :  { %v1011_v54 = vpop.xlane.xlu1 %1010  ;;  %v959_v51 = vadd.f32 %v943_v34, %v895_v37  ;;  %v1235_v16 = vsub.f32 %v1139_v60, %v1204_v45  ;;  %v987_v37 = vld [vmem:[#allocation5 + $0x58] sm:$0xff]  ;;  %v1574_v44 = vpop.eup %1573 }
 0x31d   :  { %v1041_v13 = vadd.f32 %v1011_v54, %v977_v10  ;;  %v2847_v10 = vld [vmem:[#allocation28_spill] sm:$0xff]  ;;  %1579 = vpow2.f32 %v627_v5  ;;  %v2870_v5 = vld [vmem:[#allocation33_spill] sm:$0xff] }
 0x31e   :  { %975 = vst.msk [vmem:[#allocation4 + $0x78] sm:$0xff] %vm2825_vm9, %v959_v51  ;;  %v1318_v24 = vsel %vm2827_vm8, %v1235_v16, 0.0  ;;  %v2849_v60 = vsub.f32 %v2847_v10, %v2848_v50  ;;  %v615_v16 = vmul.f32 1.442695, %v595_v20  ;;  %vm2868_vm9 = vmmov %vm2824_vm0  ;;  %v2871_v41 = vsub.f32 %v2869_v21, %v2870_v5 }
 0x31f   :  { %1057 = vst.msk [vmem:[#allocation5 + $0x8] sm:$0xff] %vm2826_vm3, %v1041_v13  ;;  %v1013_v61 = vpop.xlane.xlu0 %1012  ;;  %v1349_v15 = vrot.slane %v1318_v24, 4  ;;  %vm2872_vm3 = vmmov %vm2824_vm0 }
 0x320   :  { %v1015_v62 = vpop.xlane.xlu1 %1014  ;;  %v1042_v30 = vadd.f32 %v1013_v61, %v978_v59  ;;  %v617_v45 = vmul.f32 1.442695, %v2849_v60  ;;  %v988_v59 = vld [vmem:[#allocation5 + $0x60] sm:$0xff]  ;;  %v2853_v61 = vld [vmem:[#allocation34_spill] sm:$0xff]  ;;  %v635_v19 = vmul.f32 1.442695, %v2871_v41  ;;  %vm2873_vm8 = vmmov %vm2824_vm0 }
 0x321   :  { %v1043_v12 = vadd.f32 %v1015_v62, %v979_v22  ;;  %v1350_v27 = vadd.f32 %v1349_v15, %v1318_v24  ;;  %v989_v22 = vld [vmem:[#allocation5 + $0x68] sm:$0xff]  ;;  %v649_v60 = vld [vmem:[#allocation3 + $0x50] sm:$0xff] }
 0x322   :  { %1058 = vst.msk [vmem:[#allocation5 + $0x10] sm:$0xff] %vm2829_vm11, %v1042_v30  ;;  %1581 = vpow2.f32 %v617_v45  ;;  %v2852_v24 = vld [vmem:[#allocation32_spill] sm:$0xff]  ;;  %vm2874_vm11 = vmmov %vm2824_vm0 }
 0x323   :  { %1059 = vst.msk [vmem:[#allocation5 + $0x18] sm:$0xff] %vm2830_vm12, %v1043_v12  ;;  %v1017_v29 = vpop.xlane.xlu0 %1016  ;;  %v1351_v26 = vrot.slane %v1350_v27, 2  ;;  %v2854_v62 = vsub.f32 %v2852_v24, %v2853_v61  ;;  %v2855_v30 = vld [vmem:[#allocation36_spill] sm:$0xff]  ;;  %v2856_v12 = vld [vmem:[#allocation35_spill] sm:$0xff]  ;;  %1583 = vpow2.f32 %v615_v16  ;;  %vm2875_vm12 = vmmov %vm2824_vm0 }
 0x324   :  { %v1019_v6 = vpop.xlane.xlu1 %1018  ;;  %v1044_v56 = vadd.f32 %v1017_v29, %v980_v63  ;;  %v598_v63 = vsub.f32 %v2856_v12, %v2855_v30  ;;  %v2859_v29 = vld [vmem:[#allocation24_spill] sm:$0xff] }
 0x325   :  { %v1045_v14 = vadd.f32 %v1019_v6, %v981_v32  ;;  %v1352_v42 = vadd.f32 %v1351_v26, %v1350_v27  ;;  %v633_v15 = vmul.f32 1.442695, %v2854_v62  ;;  %v2860_v6 = vld [vmem:[#allocation26_spill] sm:$0xff]  ;;  %v644_v45 = vld [vmem:[#allocation3 + $0x28] sm:$0xff]  ;;  %v643_v61 = vld [vmem:[#allocation3 + $0x20] sm:$0xff] }
 0x326   :  { %1060 = vst.msk [vmem:[#allocation5 + $0x20] sm:$0xff] %vm2835_vm14, %v1044_v56  ;;  %v2861_v26 = vsub.f32 %v2859_v29, %v2860_v6  ;;  %v621_v25 = vmul.f32 1.442695, %v598_v63  ;;  %v652_v62 = vld [vmem:[#allocation3 + $0x68] sm:$0xff]  ;;  %vm2876_vm14 = vmmov %vm2824_vm0  ;;  %v651_v29 = vld [vmem:[#allocation3 + $0x60] sm:$0xff] }
 0x327   :  { %1061 = vst.msk [vmem:[#allocation5 + $0x28] sm:$0xff] %vm2836_vm4, %v1045_v14  ;;  %v1021_v3 = vpop.xlane.xlu0 %1020  ;;  %v1353_v7 = vrot.slane %v1352_v42, 1  ;;  %v2862_v14 = vld [vmem:[#allocation29_spill] sm:$0xff]  ;;  %1585 = vpow2.f32 %v633_v15  ;;  %vm2877_vm4 = vmmov %vm2824_vm0  ;;  %v646_v6 = vld [vmem:[#allocation3 + $0x38] sm:$0xff] }
 0x328   :  { %v1023_v31 = vpop.xlane.xlu1 %1022  ;;  %v1046_v8 = vadd.f32 %v1021_v3, %v982_v4  ;;  %v631_v56 = vmul.f32 1.442695, %v2861_v26  ;;  %v597_v35 = vsub.f32 %v2863_v57, %v2862_v14  ;;  %v2864_v4 = vld [vmem:[#allocation38_spill] sm:$0xff] }
 0x329   :  { %v1047_v53 = vadd.f32 %v1023_v31, %v983_v9  ;;  %v1354_v49 = vadd.f32 %v1353_v7, %v1352_v42  ;;  %v2865_v9 = vld [vmem:[#allocation37_spill] sm:$0xff]  ;;  %v647_v7 = vld [vmem:[#allocation3 + $0x40] sm:$0xff] }
 0x32a   :  { %1062 = vst.msk [vmem:[#allocation5 + $0x30] sm:$0xff] %vm2840_vm5, %v1046_v8  ;;  %v606_v42 = vsub.f32 %v2865_v9, %v2864_v4  ;;  %v650_v8 = vld [vmem:[#allocation3 + $0x58] sm:$0xff]  ;;  %1587 = vpow2.f32 %v631_v56  ;;  %v663_v39 = vmul.f32 %v1572_v43, %v647_v7  ;;  %vm2878_vm5 = vmmov %vm2824_vm0 }
 0x32b   :  { %1063 = vst.msk [vmem:[#allocation5 + $0x38] sm:$0xff] %vm2841_vm7, %v1047_v53  ;;  %v1025_v36 = vpop.xlane.xlu0 %1024  ;;  %1360 = vperm.xlu0 %1528, %v1354_v49   ;;  %1589 = vpow2.f32 %v621_v25  ;;  %v666_v1 = vmul.f32 %v1574_v44, %v650_v8  ;;  %vm2879_vm7 = vmmov %vm2824_vm0  ;;  %v645_v25 = vld [vmem:[#allocation3 + $0x30] sm:$0xff]  ;;  %v654_v4 = vld [vmem:[#allocation3 + $0x78] sm:$0xff] }
 0x32c   :  { %v1027_v47 = vpop.xlane.xlu1 %1026  ;;  %v1048_v17 = vadd.f32 %v1025_v36, %v984_v33  ;;  %v619_v33 = vmul.f32 1.442695, %v597_v35  ;;  %v637_v49 = vmul.f32 1.442695, %v606_v42 }
 0x32d   :  { %v1049_v40 = vadd.f32 %v1027_v47, %v985_v52  ;;  %v1576_v52 = vpop.eup %1575  ;;  %v642_v47 = vld [vmem:[#allocation3 + $0x18] sm:$0xff] }
 0x32e   :  { %1064 = vst.msk [vmem:[#allocation5 + $0x40] sm:$0xff] %vm2850_vm2, %v1048_v17  ;;  %v1578_v58 = vpop.eup %1577  ;;  %v641_v17 = vld [vmem:[#allocation3 + $0x10] sm:$0xff]  ;;  %1591 = vpow2.f32 %v619_v33  ;;  %v658_v20 = vmul.f32 %v1576_v52, %v642_v47  ;;  %vm2880_vm2 = vmmov %vm2824_vm0 }
 0x32f   :  { %1065 = vst.msk [vmem:[#allocation5 + $0x48] sm:$0xff] %vm2851_vm13, %v1049_v40  ;;  %v1029_v34 = vpop.xlane.xlu0 %1028  ;;  %v1580_v38 = vpop.eup %1579  ;;  %1593 = vpow2.f32 %v637_v49  ;;  %vm2881_vm13 = vmmov %vm2824_vm0 }
 0x330   :  { %v1031_v54 = vpop.xlane.xlu1 %1030  ;;  %v1050_v51 = vadd.f32 %v1029_v34, %v986_v48  ;;  %v657_v48 = vmul.f32 %v1578_v58, %v641_v17  ;;  %1595 = vpow2.f32 %v635_v19 }
 0x331   :  { %v1051_v13 = vadd.f32 %v1031_v54, %v987_v37  ;;  %v1582_v37 = vpop.eup %1581 }
 0x332   :  { %1066 = vst.msk [vmem:[#allocation5 + $0x50] sm:$0xff] %vm2857_vm6, %v1050_v51  ;;  %v1584_v51 = vpop.eup %1583  ;;  %v660_v16 = vmul.f32 %v1582_v37, %v644_v45  ;;  %vm2882_vm6 = vmmov %vm2824_vm0 }
 0x333   :  { %1067 = vst.msk [vmem:[#allocation5 + $0x58] sm:$0xff] %vm2858_vm15, %v1051_v13  ;;  %v1033_v32 = vpop.xlane.xlu0 %1032  ;;  %v665_v13 = vmul.f32 %v1580_v38, %v649_v60  ;;  %v659_v63 = vmul.f32 %v1584_v51, %v643_v61  ;;  %vm2883_vm15 = vmmov %vm2824_vm0 }
 0x334   :  { %v1035_v27 = vpop.xlane.xlu1 %1034  ;;  %v1052_v18 = vadd.f32 %v1033_v32, %v988_v59  ;;  %v1586_v59 = vpop.eup %1585 }
 0x335   :  { %v1053_v46 = vadd.f32 %v1035_v27, %v989_v22  ;;  %v668_v32 = vmul.f32 %v1586_v59, %v652_v62 }
 0x336   :  { %1068 = vst.msk [vmem:[#allocation5 + $0x60] sm:$0xff] %vm2866_vm10, %v1052_v18  ;;  %vm2884_vm10 = vmmov %vm2824_vm0 }
 0x337   :  { %1069 = vst.msk [vmem:[#allocation5 + $0x68] sm:$0xff] %vm2867_vm1, %v1053_v46  ;;  %v1037_v3 = vpop.xlane.xlu0 %1036  ;;  %v1588_v12 = vpop.eup %1587 }
 0x338   :  { %v1039_v31 = vpop.xlane.xlu1 %1038  ;;  %v1054_v53 = vadd.f32 %v1037_v3, %v990_v2  ;;  %v1590_v27 = vpop.eup %1589  ;;  %v667_v57 = vmul.f32 %v1588_v12, %v651_v29 }
 0x339   :  { %v1055_v11 = vadd.f32 %v1039_v31, %v991_v55  ;;  %v662_v35 = vmul.f32 %v1590_v27, %v646_v6 }
 0x33a   :  { %1070 = vst.msk [vmem:[#allocation5 + $0x70] sm:$0xff] %vm2824_vm0, %v1054_v53  ;;  %v653_v53 = vld [vmem:[#allocation3 + $0x70] sm:$0xff]  ;;  %vm1364_vm0 = vcmp.eq.s32.totalorder %v1935_v28, 1 }
 0x33b   :  { %1071 = vst.msk [vmem:[#allocation5 + $0x78] sm:$0xff] %vm2868_vm9, %v1055_v11  ;;  %v816_v23 = vpop.xlane.xlu0 %815  ;;  %v1592_v14 = vpop.eup %1591  ;;  %vm1356_vm9 = vcmp.eq.s32.totalorder %v1935_v28, 0 }
 0x33c   :  { %v822_v36 = vpop.xlane.xlu1 %821  ;;  %v839_v40 = vadd.f32 %v816_v23, %v663_v39  ;;  %v1594_v2 = vpop.eup %1593  ;;  %v661_v44 = vmul.f32 %v1592_v14, %v645_v25 }
 0x33d   :  { %v842_v0 = vadd.f32 %v822_v36, %v666_v1  ;;  %v670_v3 = vmul.f32 %v1594_v2, %v654_v4  ;;  %v1596_v31 = vpop.eup %1595  ;;  %v2885_v1 = vlaneseq }
 0x33e   :  { %856 = vst.msk [vmem:[#allocation3 + $0x40] sm:$0xff] %vm2872_vm3, %v839_v40  ;;  %v669_v52 = vmul.f32 %v1596_v31, %v653_v53 }
 0x33f   :  { %859 = vst.msk [vmem:[#allocation3 + $0x58] sm:$0xff] %vm2873_vm8, %v842_v0  ;;  %v806_v10 = vpop.xlane.xlu0 %805  ;;  %v1252_v58 = vshrl.u32 %v2885_v1, 7 }
 0x340   :  { %v804_v50 = vpop.xlane.xlu1 %803  ;;  %v834_v34 = vadd.f32 %v806_v10, %v658_v20 }
 0x341   :  { %v833_v54 = vadd.f32 %v804_v50, %v657_v48  ;;  %vm1355_vm1 = vcmp.eq.s32.totalorder %v1252_v58, 0 }
 0x342   :  { %851 = vst.msk [vmem:[#allocation3 + $0x18] sm:$0xff] %vm2874_vm11, %v834_v34  ;;  %vm1365_vm3 = vmand %vm1355_vm1, %vm1364_vm0 }
 0x343   :  { %850 = vst.msk [vmem:[#allocation3 + $0x10] sm:$0xff] %vm2875_vm12, %v833_v54  ;;  %v820_v22 = vpop.xlane.xlu0 %819  ;;  %vm1357_vm8 = vmand %vm1355_vm1, %vm1356_vm9 }
 0x344   :  { %v810_v24 = vpop.xlane.xlu1 %809  ;;  %v841_v15 = vadd.f32 %v820_v22, %v665_v13 }
 0x345   :  { %v836_v30 = vadd.f32 %v810_v24, %v660_v16 }
 0x346   :  { %858 = vst.msk [vmem:[#allocation3 + $0x50] sm:$0xff] %vm2876_vm14, %v841_v15 }
 0x347   :  { %853 = vst.msk [vmem:[#allocation3 + $0x28] sm:$0xff] %vm2877_vm4, %v836_v30  ;;  %v808_v18 = vpop.xlane.xlu0 %807 }
 0x348   :  { %v826_v46 = vpop.xlane.xlu1 %825  ;;  %v835_v26 = vadd.f32 %v808_v18, %v659_v63 }
 0x349   :  { %v844_v56 = vadd.f32 %v826_v46, %v668_v32 }
 0x34a   :  { %852 = vst.msk [vmem:[#allocation3 + $0x20] sm:$0xff] %vm2878_vm5, %v835_v26 }
 0x34b   :  { %861 = vst.msk [vmem:[#allocation3 + $0x68] sm:$0xff] %vm2879_vm7, %v844_v56  ;;  %v824_v55 = vpop.xlane.xlu0 %823 }
 0x34c   :  { %v814_v43 = vpop.xlane.xlu1 %813  ;;  %v843_v9 = vadd.f32 %v824_v55, %v667_v57 }
 0x34d   :  { %v838_v42 = vadd.f32 %v814_v43, %v662_v35 }
 0x34e   :  { %860 = vst.msk [vmem:[#allocation3 + $0x60] sm:$0xff] %vm2880_vm2, %v843_v9 }
 0x34f   :  { %855 = vst.msk [vmem:[#allocation3 + $0x38] sm:$0xff] %vm2881_vm13, %v838_v42  ;;  %v812_v7 = vpop.xlane.xlu0 %811 }
 0x350   :  { %v830_v8 = vpop.xlane.xlu1 %829  ;;  %v837_v11 = vadd.f32 %v812_v7, %v661_v44 }
 0x351   :  { %v846_v33 = vadd.f32 %v830_v8, %v670_v3 }
 0x352   :  { %854 = vst.msk [vmem:[#allocation3 + $0x30] sm:$0xff] %vm2882_vm6, %v837_v11 }
 0x353   :  { %863 = vst.msk [vmem:[#allocation3 + $0x78] sm:$0xff] %vm2883_vm15, %v846_v33  ;;  %v828_v49 = vpop.xlane.xlu0 %827 }
 0x354   :  { %v845_v39 = vadd.f32 %v828_v49, %v669_v52  ;;  %v1374_v23 = vpop.permute.xlu1 %1373 }
 0x355   :  { %v1376_v47 = vsel %vm1365_vm3, %v1374_v23, 0.0 }
 0x356   :  { %862 = vst.msk [vmem:[#allocation3 + $0x70] sm:$0xff] %vm2884_vm10, %v845_v39 }
 0x3a6   :  { %v1361_v36 = vpop.permute.xlu0 %1360 }
 0x3a7   :  { %v1363_v17 = vsel %vm1357_vm8, %v1361_v36, 0.0 }
 0x3a8   :  { %v1377_v40 = vadd.f32 %v1376_v47, %v1363_v17 }
 0x3aa   :  { %1378 = vst [vmem:[#allocation10] sm:$0xff] %v1377_v40 }
 0x3ab   :  { %1628 = shalt.err (!%p1625_p9)
}
 0x3ac   :  { %1388 = dma.vmem_to_hbm [thread:$0]  %s1386_s7, 128, %s2704_s4, [#allocation9]  }
 0x3ad   :  { %1639 = dma.done.wait [#allocation9], 128  }
 0x3ae   :  { %1640 = vsyncadd [#allocation9], 4294967168 }
 0x3af   :  { %1392 = vsyncpa [#allocation8], 1 }
 0x3b0   :  { %1393 = vsyncpa [#allocation9], 1 }

</bundles_post_ra>
